<compile_context>
chip_gen: v7x
topology: tpu7x:2x2x1
jax: 0.10.0
libtpu: 0.0.40
codegen_flags: <defaults>
</compile_context>

<pallas_src>
import functools
import math

import jax
import jax.numpy as jnp
from jax.experimental import pallas as pl
from jax.experimental.pallas import tpu as pltpu

EPS = 1e-6          # RMSNorm epsilon (Llama default)
NEG_INF = -1e30     # finite "-inf" for masking (avoids inf-inf NaNs in flash)

# Tile preferences.  At real Llama sizes (D=4096, F=14336, bf16 weights) these
# keep each kernel's double-buffered inputs + f32 accumulators under ~32 MiB,
# well inside the generation-aware VMEM limit below.  Toy test shapes collapse
# to full-array tiles.  For decode (M = B, tiny) bump TN/TK/ATTN_TKV via the
# wrapper kwargs (and optionally pipeline_mode=pl.Buffered(3) on the K/V specs).
TM = 512            # activation rows per tile
TN = 512            # output columns per tile
TK = 1024           # reduction (K) tile
TQ = 256            # packed query rows per flash-attention tile
ATTN_TKV = 256      # K/V timesteps streamed per flash-attention grid step


def _default_vmem_limit():
    """Generation-aware scoped-VMEM limit: ~3/4 of physical VMEM, capped at
    96 MiB (v5e/v6e: 128 MiB physical -> 96 MiB; v7x: 64 MiB -> 48 MiB)."""
    try:
        cap = int(pltpu.get_tpu_info().vmem_capacity_bytes)
    except Exception:
        cap = 64 * 1024 * 1024
    return max(32 * 1024 * 1024, min(3 * cap // 4, 96 * 1024 * 1024))


VMEM_LIMIT_BYTES = _default_vmem_limit()


def _pick_tile(dim, preferred, align=8):
    """Largest sublane-aligned tile <= preferred that evenly divides dim.
    Falls back to the full dimension (legal via the full-extent exception)."""
    if dim <= preferred:
        return dim
    t = (preferred // align) * align
    while t >= align:
        if dim % t == 0:
            return t
        t -= align
    # TODO(synk): pad/mask ragged dims instead of falling back to a full-dim tile.
    return dim


def _cparams(dimension_semantics):
    return pltpu.CompilerParams(dimension_semantics=dimension_semantics,
                                vmem_limit_bytes=VMEM_LIMIT_BYTES)


# ----------------------------- Pallas kernels ------------------------------
#
# Fused RMSNorm + matmul kernels.  The x in_spec is a full-D row panel whose
# block index only depends on i, so Pallas fetches it from HBM once per row
# block.  At the first (j==0, k==0) step of each row block the kernel computes
# the RMS scale and writes the normalized, weight-dtype activation panel into a
# (nk, tm, tk) VMEM scratch; every subsequent (j, k) tile reuses it (no per-tile
# norm recompute, no per-tile cast).  NOTE: the j axis must be "arbitrary" so a
# megacore split can never start a core mid-row-block before the scratch fill.


def _rmsnorm_matmul_kernel(x_ref, g_ref, w_ref, o_ref, xn_ref, acc_ref):
    j = pl.program_id(1)
    k = pl.program_id(2)
    tk = w_ref.shape[0]
    nk = xn_ref.shape[0]

    @pl.when((j == 0) & (k == 0))
    def _():
        x = x_ref[...].astype(jnp.float32)
        scale = jax.lax.rsqrt(jnp.mean(x * x, axis=-1, keepdims=True) + EPS)
        xn = (x * scale * g_ref[...].astype(jnp.float32)).astype(xn_ref.dtype)
        for c in range(nk):                       # static unroll over K chunks
            xn_ref[c] = xn[:, c * tk:(c + 1) * tk]

    @pl.when(k == 0)
    def _():
        acc_ref[...] = jnp.zeros_like(acc_ref)

    acc_ref[...] += jnp.dot(xn_ref[k], w_ref[...],
                            preferred_element_type=jnp.float32)

    @pl.when(k == pl.num_programs(2) - 1)
    def _():
        o_ref[...] = acc_ref[...].astype(o_ref.dtype)


def rmsnorm_matmul(x, gamma, w, *, tm=TM, tn=TN, tk=TK):
    """(rmsnorm(x) * gamma) @ w, norm fused into the matmul."""
    M, D = x.shape
    N = w.shape[1]
    tm, tn, tk = _pick_tile(M, tm), _pick_tile(N, tn), _pick_tile(D, tk)
    nk = D // tk
    return pl.pallas_call(
        _rmsnorm_matmul_kernel,
        out_shape=jax.ShapeDtypeStruct((M, N), w.dtype),
        grid_spec=pltpu.PrefetchScalarGridSpec(
            num_scalar_prefetch=0,
            grid=(M // tm, N // tn, nk),
            in_specs=[
                pl.BlockSpec((tm, D), lambda i, j, k: (i, 0)),   # full-D row panel
                pl.BlockSpec((1, D), lambda i, j, k: (0, 0)),
                pl.BlockSpec((tk, tn), lambda i, j, k: (k, j)),
            ],
            out_specs=pl.BlockSpec((tm, tn), lambda i, j, k: (i, j)),
            scratch_shapes=[pltpu.VMEM((nk, tm, tk), w.dtype),    # cached xn panel
                            pltpu.VMEM((tm, tn), jnp.float32)],
        ),
        compiler_params=_cparams(("parallel", "arbitrary", "arbitrary")),
    )(x, gamma.reshape(1, -1), w)


def _rmsnorm_swiglu_kernel(x_ref, g_ref, w1_ref, w3_ref, o_ref,
                           xn_ref, acc1_ref, acc3_ref):
    j = pl.program_id(1)
    k = pl.program_id(2)
    tk = w1_ref.shape[0]
    nk = xn_ref.shape[0]

    @pl.when((j == 0) & (k == 0))
    def _():
        x = x_ref[...].astype(jnp.float32)
        scale = jax.lax.rsqrt(jnp.mean(x * x, axis=-1, keepdims=True) + EPS)
        xn = (x * scale * g_ref[...].astype(jnp.float32)).astype(xn_ref.dtype)
        for c in range(nk):
            xn_ref[c] = xn[:, c * tk:(c + 1) * tk]

    @pl.when(k == 0)
    def _():
        acc1_ref[...] = jnp.zeros_like(acc1_ref)
        acc3_ref[...] = jnp.zeros_like(acc3_ref)

    xn_k = xn_ref[k]
    acc1_ref[...] += jnp.dot(xn_k, w1_ref[...], preferred_element_type=jnp.float32)
    acc3_ref[...] += jnp.dot(xn_k, w3_ref[...], preferred_element_type=jnp.float32)

    @pl.when(k == pl.num_programs(2) - 1)
    def _():
        h1 = acc1_ref[...]                                        # f32 silu
        o_ref[...] = (h1 * jax.nn.sigmoid(h1) * acc3_ref[...]).astype(o_ref.dtype)


def rmsnorm_swiglu(x, gamma, w1, w3, *, tm=TM, tn=TN, tk=TK):
    """silu((rmsnorm(x)*gamma) @ w1) * ((rmsnorm(x)*gamma) @ w3), norm fused."""
    M, D = x.shape
    F = w1.shape[1]
    tm, tn, tk = _pick_tile(M, tm), _pick_tile(F, tn), _pick_tile(D, tk)
    nk = D // tk
    return pl.pallas_call(
        _rmsnorm_swiglu_kernel,
        out_shape=jax.ShapeDtypeStruct((M, F), w1.dtype),
        grid_spec=pltpu.PrefetchScalarGridSpec(
            num_scalar_prefetch=0,
            grid=(M // tm, F // tn, nk),
            in_specs=[
                pl.BlockSpec((tm, D), lambda i, j, k: (i, 0)),
                pl.BlockSpec((1, D), lambda i, j, k: (0, 0)),
                pl.BlockSpec((tk, tn), lambda i, j, k: (k, j)),
                pl.BlockSpec((tk, tn), lambda i, j, k: (k, j)),
            ],
            out_specs=pl.BlockSpec((tm, tn), lambda i, j, k: (i, j)),
            scratch_shapes=[pltpu.VMEM((nk, tm, tk), w1.dtype),
                            pltpu.VMEM((tm, tn), jnp.float32),
                            pltpu.VMEM((tm, tn), jnp.float32)],
        ),
        compiler_params=_cparams(("parallel", "arbitrary", "arbitrary")),
    )(x, gamma.reshape(1, -1), w1, w3)


def _matmul_residual_kernel(a_ref, w_ref, r_ref, o_ref, acc_ref):
    k = pl.program_id(2)

    @pl.when(k == 0)
    def _():
        acc_ref[...] = jnp.zeros_like(acc_ref)

    acc_ref[...] += jnp.dot(a_ref[...].astype(w_ref.dtype), w_ref[...],
                            preferred_element_type=jnp.float32)

    @pl.when(k == pl.num_programs(2) - 1)
    def _():
        o_ref[...] = (acc_ref[...]
                      + r_ref[...].astype(jnp.float32)).astype(o_ref.dtype)


def matmul_residual(a, w, res, *, tm=TM, tn=TN, tk=TK):
    """a @ w + res, with res updated in place (input_output_aliases)."""
    M, K = a.shape
    N = w.shape[1]
    tm, tn, tk = _pick_tile(M, tm), _pick_tile(N, tn), _pick_tile(K, tk)
    return pl.pallas_call(
        _matmul_residual_kernel,
        out_shape=jax.ShapeDtypeStruct((M, N), res.dtype),
        grid_spec=pltpu.PrefetchScalarGridSpec(
            num_scalar_prefetch=0,
            grid=(M // tm, N // tn, K // tk),
            in_specs=[
                pl.BlockSpec((tm, tk), lambda i, j, k: (i, k)),
                pl.BlockSpec((tk, tn), lambda i, j, k: (k, j)),
                pl.BlockSpec((tm, tn), lambda i, j, k: (i, j)),
            ],
            out_specs=pl.BlockSpec((tm, tn), lambda i, j, k: (i, j)),
            scratch_shapes=[pltpu.VMEM((tm, tn), jnp.float32)],
        ),
        compiler_params=_cparams(("parallel", "parallel", "arbitrary")),
        input_output_aliases={2: 0},     # update the residual buffer in place
    )(a, w, res)


def _flash_attn_kernel(q_ref, k_ref, v_ref, o_ref, m_ref, l_ref, acc_ref, *,
                       scale, pos, seqlen, tq, tkv):
    r = pl.program_id(2)
    t = pl.program_id(3)

    @pl.when(t == 0)
    def _():
        m_ref[...] = jnp.full_like(m_ref, NEG_INF)
        l_ref[...] = jnp.zeros_like(l_ref)
        acc_ref[...] = jnp.zeros_like(acc_ref)

    # Query-position bounds of this q-row tile (static Python branch matches how
    # the wrapper tiled the packed (rep-major) rows).
    if tq % seqlen == 0:
        # Tile spans whole sequence repetition(s): positions wrap every seqlen.
        q_lo = pos
        q_hi = pos + seqlen - 1
    else:
        # tq divides seqlen: positions in the tile are a contiguous range.
        q_lo = pos + (r * tq) % seqlen
        q_hi = q_lo + tq - 1
    k_lo = t * tkv

    @pl.when(k_lo <= q_hi)        # skip KV tiles that are entirely in the future
    def _():
        q = q_ref[...] * scale                        # scale on q (hd < tkv)
        # K fed to the MXU untransposed (contract last dims of q and k).
        s = jax.lax.dot_general(q, k_ref[...], (((1,), (1,)), ((), ())),
                                preferred_element_type=jnp.float32)

        def _masked(sv):
            row = jax.lax.broadcasted_iota(jnp.int32, sv.shape, 0)
            col = jax.lax.broadcasted_iota(jnp.int32, sv.shape, 1)
            if tq % seqlen == 0:
                q_pos = pos + row % seqlen
            else:
                q_pos = q_lo + row
            return jnp.where(k_lo + col <= q_pos, sv, NEG_INF)

        # Only tiles that can contain future keys pay for the causal mask.
        s = jax.lax.cond(k_lo + tkv - 1 > q_lo, _masked, lambda sv: sv, s)

        m_prev = m_ref[...]
        m_new = jnp.maximum(m_prev, jnp.max(s, axis=-1, keepdims=True))
        alpha = jnp.exp(m_prev - m_new)
        # TODO(synk): on v6e/v7x emit the exp in bf16 to double EUP throughput.
        p = jnp.exp(s - m_new)
        l_ref[...] = alpha * l_ref[...] + jnp.sum(p, axis=-1, keepdims=True)
        acc_ref[...] = alpha * acc_ref[...] + jnp.dot(
            p.astype(v_ref.dtype), v_ref[...], preferred_element_type=jnp.float32)
        m_ref[...] = m_new

    @pl.when(t == pl.num_programs(3) - 1)
    def _():
        o_ref[...] = (acc_ref[...] *
                      pl.reciprocal(l_ref[...], approx=True)).astype(o_ref.dtype)


def flash_attention(q, k, v, *, scale, pos, seqlen, tq=TQ, tkv=ATTN_TKV):
    # q: (B, G, R, hd) with R = n_rep*S -- the n_rep query heads of each KV
    #    group packed (rep-major) into the row dim so the shared K/V block is
    #    read once per group (no jnp.repeat of the KV cache).
    # k, v: (B, G, T, hd).  T may include trailing padded positions; they lie in
    #    the causal future of every query so the in-kernel mask removes them.
    B, G, R, hd = q.shape
    T = k.shape[2]
    tkv = _pick_tile(T, tkv)
    tq = _pick_tile(seqlen, tq)          # divides seqlen -> contiguous positions
    if tq % 8 != 0 and tq != R:
        tq = R                           # decode / ragged: keep all rows in one tile
    grid = (B, G, R // tq, T // tkv)
    kernel = functools.partial(_flash_attn_kernel, scale=scale, pos=pos,
                               seqlen=seqlen, tq=tq, tkv=tkv)
    return pl.pallas_call(
        kernel,
        out_shape=jax.ShapeDtypeStruct((B, G, R, hd), q.dtype),
        grid_spec=pltpu.PrefetchScalarGridSpec(
            num_scalar_prefetch=0,
            grid=grid,
            in_specs=[
                pl.BlockSpec((None, None, tq, hd), lambda b, g, r, t: (b, g, r, 0)),
                pl.BlockSpec((None, None, tkv, hd), lambda b, g, r, t: (b, g, t, 0)),
                pl.BlockSpec((None, None, tkv, hd), lambda b, g, r, t: (b, g, t, 0)),
            ],
            out_specs=pl.BlockSpec((None, None, tq, hd),
                                   lambda b, g, r, t: (b, g, r, 0)),
            scratch_shapes=[pltpu.VMEM((tq, 1), jnp.float32),
                            pltpu.VMEM((tq, 1), jnp.float32),
                            pltpu.VMEM((tq, hd), jnp.float32)],
        ),
        compiler_params=_cparams(("parallel", "parallel", "parallel", "arbitrary")),
    )(q, k, v)


# ------------------------------- JAX glue -----------------------------------

def rope_cos_sin(pos, seqlen, head_dim, theta=500000.0):
    inv_freq = 1.0 / (theta ** (jnp.arange(0, head_dim, 2, dtype=jnp.float32)
                                / head_dim))
    t = jnp.arange(pos, pos + seqlen, dtype=jnp.float32)
    ang = jnp.outer(t, inv_freq)                              # (S, hd//2)
    return jnp.cos(ang), jnp.sin(ang)


def apply_rope(x, cos, sin):
    # x: (B, S, H, hd); consecutive-pair complex rotation (torch.view_as_complex)
    # TODO(synk): fuse RoPE (pltpu.roll-style rotation) into the QKV projection
    # epilogue to remove this lane-unfriendly extra elementwise pass over Q/K.
    xr = x[..., 0::2]
    xi = x[..., 1::2]
    c = cos[None, :, None, :]
    s = sin[None, :, None, :]
    out_r = xr * c - xi * s
    out_i = xr * s + xi * c
    return jnp.stack([out_r, out_i], axis=-1).reshape(x.shape)


def prepare_params(raw, compute_dtype=jnp.float32):
    """One-time parameter prep: pre-fuse [wq|wk|wv] (no per-forward concat) and
    cast matmul weights to the MXU compute dtype (pass jnp.bfloat16 in
    production; norm gains, stats and all accumulations stay f32)."""
    return dict(
        attn_norm_g=raw["attn_norm_g"].astype(jnp.float32),
        ffn_norm_g=raw["ffn_norm_g"].astype(jnp.float32),
        wqkv=jnp.concatenate([raw["wq"], raw["wk"], raw["wv"]],
                             axis=1).astype(compute_dtype),
        wo=raw["wo"].astype(compute_dtype),
        w1=raw["w1"].astype(compute_dtype),
        w3=raw["w3"].astype(compute_dtype),
        w2=raw["w2"].astype(compute_dtype),
    )


@functools.partial(jax.jit,
                   static_argnames=("pos", "n_heads", "n_kv_heads", "head_dim"))
def transformer_block(params, x, cache_k, cache_v, *, pos, n_heads,
                      n_kv_heads, head_dim):
    # Standard Llama causal mask, generated inside the attention kernel from `pos`.
    # TODO(synk): arbitrary additive masks (e.g. padding masks) would need to be
    # streamed into the attention kernel as an extra input.
    B, S, D = x.shape
    G = n_kv_heads
    n_rep = n_heads // n_kv_heads
    act_dtype = params["wqkv"].dtype              # bf16 in production, f32 here
    x_flat = x.reshape(B * S, D)

    # ---- attention branch: x + wo(attn(rmsnorm(x))) ----
    qkv = rmsnorm_matmul(x_flat, params["attn_norm_g"], params["wqkv"])   # Pallas
    q_dim = n_heads * head_dim
    kv_dim = G * head_dim
    q = qkv[:, :q_dim].reshape(B, S, n_heads, head_dim)
    k = qkv[:, q_dim:q_dim + kv_dim].reshape(B, S, G, head_dim)
    v = qkv[:, q_dim + kv_dim:].reshape(B, S, G, head_dim)

    cos, sin = rope_cos_sin(pos, S, head_dim)
    q = apply_rope(q, cos, sin).astype(act_dtype)
    k = apply_rope(k, cos, sin).astype(act_dtype)

    # KV cache layout: (max_bsz, n_kv_heads, max_seqlen, head_dim) so the
    # attention kernel streams K/V directly without repeats.
    # TODO(synk): write k/v into the cache from the projection kernel (via
    # input_output_aliases) to drop these transposed copies.
    cache_k = jax.lax.dynamic_update_slice(
        cache_k, k.transpose(0, 2, 1, 3).astype(cache_k.dtype), (0, 0, pos, 0))
    cache_v = jax.lax.dynamic_update_slice(
        cache_v, v.transpose(0, 2, 1, 3).astype(cache_v.dtype), (0, 0, pos, 0))

    # Pad the streamed KV length to a sublane multiple; padded positions are in
    # the causal future of every query so the in-kernel mask removes them.
    T = min(cache_k.shape[2], -(-(pos + S) // 8) * 8)
    keys = cache_k[:B, :, :T, :]                 # (B, G, T, hd) -- no jnp.repeat
    vals = cache_v[:B, :, :T, :]

    # Pack the n_rep query heads of each KV group into the row dimension:
    # (B, S, H, hd) -> (B, G, n_rep*S, hd), rows ordered (rep, qpos).
    qg = q.transpose(0, 2, 1, 3).reshape(B, G, n_rep * S, head_dim)

    attn = flash_attention(qg, keys, vals, scale=1.0 / math.sqrt(head_dim),
                           pos=pos, seqlen=S)                             # Pallas
    # TODO(synk): emit the flash output directly in (B, S, H*hd) layout (per-head
    # out_spec scatter) to drop this XLA transpose (one HBM round trip).
    attn = (attn.reshape(B, G, n_rep, S, head_dim)
                .transpose(0, 3, 1, 2, 4)
                .reshape(B * S, n_heads * head_dim))

    h = matmul_residual(attn, params["wo"], x_flat)                       # Pallas

    # ---- ffn branch: h + w2(silu(w1(rmsnorm(h))) * w3(rmsnorm(h))) ----
    gate = rmsnorm_swiglu(h, params["ffn_norm_g"],
                          params["w1"], params["w3"])                     # Pallas
    out = matmul_residual(gate, params["w2"], h)                          # Pallas
    return out.reshape(B, S, D)


# --------------------------- pure-JAX reference ------------------------------

def reference_block(params, x, pos, mask, cache_k, cache_v, *,
                    n_heads, n_kv_heads, head_dim):
    def rmsnorm(z, g):
        return z * jax.lax.rsqrt(jnp.mean(z * z, -1, keepdims=True) + EPS) * g

    B, S, D = x.shape
    xn = rmsnorm(x, params["attn_norm_g"])
    q = (xn @ params["wq"]).reshape(B, S, n_heads, head_dim)
    k = (xn @ params["wk"]).reshape(B, S, n_kv_heads, head_dim)
    v = (xn @ params["wv"]).reshape(B, S, n_kv_heads, head_dim)
    cos, sin = rope_cos_sin(pos, S, head_dim)
    q = apply_rope(q, cos, sin)
    k = apply_rope(k, cos, sin)
    cache_k = jax.lax.dynamic_update_slice(cache_k, k.transpose(0, 2, 1, 3),
                                           (0, 0, pos, 0))
    cache_v = jax.lax.dynamic_update_slice(cache_v, v.transpose(0, 2, 1, 3),
                                           (0, 0, pos, 0))
    n_rep = n_heads // n_kv_heads
    T = pos + S
    keys = jnp.repeat(cache_k[:B, :, :T], n_rep, axis=1)      # (B, H, T, hd)
    vals = jnp.repeat(cache_v[:B, :, :T], n_rep, axis=1)
    qh = q.transpose(0, 2, 1, 3)
    s = jnp.einsum("bhqd,bhkd->bhqk", qh, keys) / math.sqrt(head_dim) + mask
    p = jax.nn.softmax(s, axis=-1)
    o = (jnp.einsum("bhqk,bhkd->bhqd", p, vals)
         .transpose(0, 2, 1, 3).reshape(B, S, -1))
    h = x + o @ params["wo"]
    hn = rmsnorm(h, params["ffn_norm_g"])
    g1 = hn @ params["w1"]
    g3 = hn @ params["w3"]
    return h + (g1 * jax.nn.sigmoid(g1) * g3) @ params["w2"]


# --------------------------------- main --------------------------------------

if __name__ == "__main__":
    model_dim, head_dim, n_heads, n_kv_heads = 32, 8, 4, 2
    ff_dim, max_bsz, max_seqlen = 64, 2, 16
    B, S, pos = 2, 8, 4       # pos > 0 exercises the in-kernel causal offset

    key = jax.random.PRNGKey(0)
    ks = jax.random.split(key, 8)
    init = lambda k, shp: 0.02 * jax.random.normal(k, shp, dtype=jnp.float32)

    raw_params = dict(
        attn_norm_g=jnp.ones((model_dim,), jnp.float32),       # RMSNorm init
        wq=init(ks[0], (model_dim, n_heads * head_dim)),
        wk=init(ks[1], (model_dim, n_kv_heads * head_dim)),
        wv=init(ks[2], (model_dim, n_kv_heads * head_dim)),
        wo=init(ks[3], (n_heads * head_dim, model_dim)),
        ffn_norm_g=jnp.ones((model_dim,), jnp.float32),
        w1=init(ks[4], (model_dim, ff_dim)),
        w3=init(ks[5], (model_dim, ff_dim)),
        w2=init(ks[6], (ff_dim, model_dim)),
    )
    x = jax.random.normal(ks[7], (B, S, model_dim), dtype=jnp.float32)

    # KV cache in (max_bsz, n_kv_heads, max_seqlen, head_dim) layout.
    cache_k = jnp.zeros((max_bsz, n_kv_heads, max_seqlen, head_dim), jnp.float32)
    cache_v = jnp.zeros_like(cache_k)

    # Reference uses the explicit additive causal mask, like the PyTorch module.
    T = pos + S
    row = jnp.arange(S)[:, None]
    col = jnp.arange(T)[None, :]
    mask = jnp.where(col <= pos + row, 0.0, -jnp.inf).astype(jnp.float32)
    ref = reference_block(raw_params, x, pos, mask, cache_k, cache_v,
                          n_heads=n_heads, n_kv_heads=n_kv_heads,
                          head_dim=head_dim)

    # ---- f32 path: tight check against the f32 reference ----
    params_f32 = prepare_params(raw_params, jnp.float32)
    out = transformer_block(params_f32, x, cache_k, cache_v, pos=pos,
                            n_heads=n_heads, n_kv_heads=n_kv_heads,
                            head_dim=head_dim)
    out = jax.block_until_ready(out)
    assert out.shape == (B, S, model_dim)
    assert jnp.allclose(out, ref, atol=2e-3, rtol=2e-3), "f32 mismatch vs reference"

    # ---- bf16 production path: bf16 weights/activations/KV cache, f32 residual ----
    params_bf16 = prepare_params(raw_params, jnp.bfloat16)
    out_bf16 = transformer_block(params_bf16, x,
                                 cache_k.astype(jnp.bfloat16),
                                 cache_v.astype(jnp.bfloat16),
                                 pos=pos, n_heads=n_heads,
                                 n_kv_heads=n_kv_heads, head_dim=head_dim)
    out_bf16 = jax.block_until_ready(out_bf16)
    assert out_bf16.shape == (B, S, model_dim)
    assert jnp.allclose(out_bf16, ref, atol=3e-2, rtol=3e-2), "bf16 mismatch vs reference"

    print("KERNEL_OK")
</pallas_src>

<mosaic_0001>
module attributes {stable_mosaic.version = 11 : i64} {
  func.func @_rmsnorm_matmul_kernel(%arg0: i32, %arg1: i32, %arg2: i32, %arg3: memref<16x32xf32, #tpu.memory_space<vmem>>, %arg4: memref<1x32xf32, #tpu.memory_space<vmem>>, %arg5: memref<32x64xf32, #tpu.memory_space<vmem>>, %arg6: memref<16x64xf32, #tpu.memory_space<vmem>>, %arg7: memref<1x16x32xf32, #tpu.memory_space<vmem>>, %arg8: memref<16x64xf32, #tpu.memory_space<vmem>>) attributes {dimension_semantics = [#tpu.dimension_semantics<parallel>, #tpu.dimension_semantics<arbitrary>, #tpu.dimension_semantics<arbitrary>], iteration_bounds = array<i64: 1, 1, 1>, scalar_prefetch = 0 : i64, scratch_operands = 2 : i64, tpu.core_type = #tpu.core_type<tc>, window_params = [{transform_indices = @transform_0, window_bounds = array<i64: 16, 32>}, {pipeline_mode = #tpu.pipeline_mode<synchronous>, transform_indices = @transform_1, window_bounds = array<i64: 1, 32>}, {transform_indices = @transform_2, window_bounds = array<i64: 32, 64>}, {transform_indices = @transform_3, window_bounds = array<i64: 16, 64>}]} {
    %c0_i32 = arith.constant 0 : i32
    %0 = arith.cmpi eq, %arg1, %c0_i32 : i32
    %c0_i32_0 = arith.constant 0 : i32
    %1 = arith.cmpi eq, %arg2, %c0_i32_0 : i32
    %2 = arith.andi %0, %1 : i1
    %3 = arith.extui %2 : i1 to i32
    %c0_i32_1 = arith.constant 0 : i32
    %4 = arith.cmpi ne, %3, %c0_i32_1 : i32
    scf.if %4 {
      %c0_13 = arith.constant 0 : index
      %c0_14 = arith.constant 0 : index
      %19 = vector.load %arg3[%c0_13, %c0_14] : memref<16x32xf32, #tpu.memory_space<vmem>>, vector<16x32xf32>
      %20 = arith.mulf %19, %19 : vector<16x32xf32>
      %cst_15 = arith.constant dense<0.000000e+00> : vector<16xf32>
      %21 = vector.multi_reduction <add>, %20, %cst_15 [1] : vector<16x32xf32> to vector<16xf32>
      %22 = vector.shape_cast %21 : vector<16xf32> to vector<16x1xf32>
      %cst_16 = arith.constant 3.200000e+01 : f32
      %23 = vector.broadcast %cst_16 : f32 to vector<16x1xf32>
      %24 = arith.divf %22, %23 : vector<16x1xf32>
      %cst_17 = arith.constant 9.99999997E-7 : f32
      %25 = vector.broadcast %cst_17 : f32 to vector<16x1xf32>
      %26 = arith.addf %24, %25 : vector<16x1xf32>
      %27 = math.rsqrt %26 : vector<16x1xf32>
      %28 = vector.broadcast %27 : vector<16x1xf32> to vector<16x32xf32>
      %29 = arith.mulf %19, %28 : vector<16x32xf32>
      %c0_18 = arith.constant 0 : index
      %c0_19 = arith.constant 0 : index
      %30 = vector.load %arg4[%c0_18, %c0_19] : memref<1x32xf32, #tpu.memory_space<vmem>>, vector<1x32xf32>
      %31 = vector.broadcast %30 : vector<1x32xf32> to vector<16x32xf32>
      %32 = arith.mulf %29, %31 : vector<16x32xf32>
      %c0_20 = arith.constant 0 : index
      %c0_21 = arith.constant 0 : index
      %c0_22 = arith.constant 0 : index
      %33 = vector.load %arg7[%c0_20, %c0_21, %c0_22] : memref<1x16x32xf32, #tpu.memory_space<vmem>>, vector<1x16x32xf32>
      %34 = vector.shape_cast %33 : vector<1x16x32xf32> to vector<16x32xf32>
      %35 = vector.shape_cast %32 : vector<16x32xf32> to vector<1x16x32xf32>
      tpu.vector_store %arg7[%c0_20, %c0_21, %c0_22], %35 {strides = array<i32>} : memref<1x16x32xf32, #tpu.memory_space<vmem>>, vector<1x16x32xf32>,
    } else {
    }
    %c0_i32_2 = arith.constant 0 : i32
    %5 = arith.cmpi eq, %arg2, %c0_i32_2 : i32
    %6 = arith.extui %5 : i1 to i32
    %c0_i32_3 = arith.constant 0 : i32
    %7 = arith.cmpi ne, %6, %c0_i32_3 : i32
    scf.if %7 {
      %cst_13 = arith.constant 0.000000e+00 : f32
      %19 = vector.broadcast %cst_13 : f32 to vector<16x64xf32>
      %c0_14 = arith.constant 0 : index
      %c0_15 = arith.constant 0 : index
      %20 = vector.load %arg8[%c0_14, %c0_15] : memref<16x64xf32, #tpu.memory_space<vmem>>, vector<16x64xf32>
      tpu.vector_store %arg8[%c0_14, %c0_15], %19 {strides = array<i32>} : memref<16x64xf32, #tpu.memory_space<vmem>>, vector<16x64xf32>,
    } else {
    }
    %c0 = arith.constant 0 : index
    %c0_4 = arith.constant 0 : index
    %8 = vector.load %arg8[%c0, %c0_4] : memref<16x64xf32, #tpu.memory_space<vmem>>, vector<16x64xf32>
    %9 = arith.index_cast %arg2 : i32 to index
    %c0_5 = arith.constant 0 : index
    %c0_6 = arith.constant 0 : index
    %10 = vector.load %arg7[%9, %c0_5, %c0_6] : memref<1x16x32xf32, #tpu.memory_space<vmem>>, vector<1x16x32xf32>
    %11 = vector.shape_cast %10 : vector<1x16x32xf32> to vector<16x32xf32>
    %c0_7 = arith.constant 0 : index
    %c0_8 = arith.constant 0 : index
    %12 = vector.load %arg5[%c0_7, %c0_8] : memref<32x64xf32, #tpu.memory_space<vmem>>, vector<32x64xf32>
    %cst = arith.constant dense<0.000000e+00> : vector<16x64xf32>
    %13 = tpu.matmul %11, %12, %cst {dimension_numbers = #tpu.dot_dimension_numbers<[1], [0], [0], [1], [0, 0, 1, 1], [], []>} : vector<16x32xf32>, vector<32x64xf32>, vector<16x64xf32> -> vector<16x64xf32>
    %14 = arith.addf %8, %13 : vector<16x64xf32>
    %c0_9 = arith.constant 0 : index
    %c0_10 = arith.constant 0 : index
    %15 = vector.load %arg8[%c0_9, %c0_10] : memref<16x64xf32, #tpu.memory_space<vmem>>, vector<16x64xf32>
    tpu.vector_store %arg8[%c0_9, %c0_10], %14 {strides = array<i32>} : memref<16x64xf32, #tpu.memory_space<vmem>>, vector<16x64xf32>,
    %c0_i32_11 = arith.constant 0 : i32
    %16 = arith.cmpi eq, %arg2, %c0_i32_11 : i32
    %17 = arith.extui %16 : i1 to i32
    %c0_i32_12 = arith.constant 0 : i32
    %18 = arith.cmpi ne, %17, %c0_i32_12 : i32
    scf.if %18 {
      %c0_13 = arith.constant 0 : index
      %c0_14 = arith.constant 0 : index
      %19 = vector.load %arg8[%c0_13, %c0_14] : memref<16x64xf32, #tpu.memory_space<vmem>>, vector<16x64xf32>
      %c0_15 = arith.constant 0 : index
      %c0_16 = arith.constant 0 : index
      %20 = vector.load %arg6[%c0_15, %c0_16] : memref<16x64xf32, #tpu.memory_space<vmem>>, vector<16x64xf32>
      tpu.vector_store %arg6[%c0_15, %c0_16], %19 {strides = array<i32>} : memref<16x64xf32, #tpu.memory_space<vmem>>, vector<16x64xf32>,
    } else {
    }
    return
  }
  func.func @transform_0(%arg0: i32, %arg1: i32, %arg2: i32) -> (i32, i32) {
    %c0_i32 = arith.constant 0 : i32
    %c0_i32_0 = arith.constant 0 : i32
    return %arg0, %c0_i32 : i32, i32
  }
  func.func @transform_1(%arg0: i32, %arg1: i32, %arg2: i32) -> (i32, i32) {
    %c0_i32 = arith.constant 0 : i32
    %c0_i32_0 = arith.constant 0 : i32
    %c0_i32_1 = arith.constant 0 : i32
    return %c0_i32, %c0_i32_0 : i32, i32
  }
  func.func @transform_2(%arg0: i32, %arg1: i32, %arg2: i32) -> (i32, i32) {
    %c0_i32 = arith.constant 0 : i32
    return %arg2, %arg1 : i32, i32
  }
  func.func @transform_3(%arg0: i32, %arg1: i32, %arg2: i32) -> (i32, i32) {
    %c0_i32 = arith.constant 0 : i32
    return %arg0, %arg1 : i32, i32
  }
}

module attributes {stable_mosaic.version = 11 : i64} {
  func.func @_flash_attn_kernel(%arg0: i32, %arg1: i32, %arg2: i32, %arg3: i32, %arg4: memref<1x1x8x8xf32, #tpu.memory_space<vmem>>, %arg5: memref<1x1x16x8xf32, #tpu.memory_space<vmem>>, %arg6: memref<1x1x16x8xf32, #tpu.memory_space<vmem>>, %arg7: memref<1x1x8x8xf32, #tpu.memory_space<vmem>>, %arg8: memref<8x1xf32, #tpu.memory_space<vmem>>, %arg9: memref<8x1xf32, #tpu.memory_space<vmem>>, %arg10: memref<8x8xf32, #tpu.memory_space<vmem>>) attributes {dimension_semantics = [#tpu.dimension_semantics<parallel>, #tpu.dimension_semantics<parallel>, #tpu.dimension_semantics<parallel>, #tpu.dimension_semantics<arbitrary>], iteration_bounds = array<i64: 2, 2, 2, 1>, scalar_prefetch = 0 : i64, scratch_operands = 3 : i64, tpu.core_type = #tpu.core_type<tc>, window_params = [{transform_indices = @transform_0, window_bounds = array<i64: 1, 1, 8, 8>}, {transform_indices = @transform_1, window_bounds = array<i64: 1, 1, 16, 8>}, {transform_indices = @transform_2, window_bounds = array<i64: 1, 1, 16, 8>}, {transform_indices = @transform_3, window_bounds = array<i64: 1, 1, 8, 8>}]} {
    %c0_i32 = arith.constant 0 : i32
    %0 = arith.cmpi eq, %arg3, %c0_i32 : i32
    %1 = arith.extui %0 : i1 to i32
    %c0_i32_0 = arith.constant 0 : i32
    %2 = arith.cmpi ne, %1, %c0_i32_0 : i32
    scf.if %2 {
      %cst = arith.constant -1.000000e+30 : f32
      %10 = vector.broadcast %cst : f32 to vector<8x1xf32>
      %c0 = arith.constant 0 : index
      %c0_4 = arith.constant 0 : index
      %11 = vector.load %arg8[%c0, %c0_4] : memref<8x1xf32, #tpu.memory_space<vmem>>, vector<8x1xf32>
      tpu.vector_store %arg8[%c0, %c0_4], %10 {strides = array<i32>} : memref<8x1xf32, #tpu.memory_space<vmem>>, vector<8x1xf32>,
      %cst_5 = arith.constant 0.000000e+00 : f32
      %12 = vector.broadcast %cst_5 : f32 to vector<8x1xf32>
      %c0_6 = arith.constant 0 : index
      %c0_7 = arith.constant 0 : index
      %13 = vector.load %arg9[%c0_6, %c0_7] : memref<8x1xf32, #tpu.memory_space<vmem>>, vector<8x1xf32>
      tpu.vector_store %arg9[%c0_6, %c0_7], %12 {strides = array<i32>} : memref<8x1xf32, #tpu.memory_space<vmem>>, vector<8x1xf32>,
      %cst_8 = arith.constant 0.000000e+00 : f32
      %14 = vector.broadcast %cst_8 : f32 to vector<8x8xf32>
      %c0_9 = arith.constant 0 : index
      %c0_10 = arith.constant 0 : index
      %15 = vector.load %arg10[%c0_9, %c0_10] : memref<8x8xf32, #tpu.memory_space<vmem>>, vector<8x8xf32>
      tpu.vector_store %arg10[%c0_9, %c0_10], %14 {strides = array<i32>} : memref<8x8xf32, #tpu.memory_space<vmem>>, vector<8x8xf32>,
    } else {
    }
    %c16_i32 = arith.constant 16 : i32
    %3 = arith.muli %arg3, %c16_i32 : i32
    %c11_i32 = arith.constant 11 : i32
    %4 = arith.cmpi sle, %3, %c11_i32 : i32
    %5 = arith.extui %4 : i1 to i32
    %c0_i32_1 = arith.constant 0 : i32
    %6 = arith.cmpi ne, %5, %c0_i32_1 : i32
    scf.if %6 {
      %c0 = arith.constant 0 : index
      %c0_4 = arith.constant 0 : index
      %c0_5 = arith.constant 0 : index
      %c0_6 = arith.constant 0 : index
      %10 = vector.load %arg4[%c0, %c0_4, %c0_5, %c0_6] : memref<1x1x8x8xf32, #tpu.memory_space<vmem>>, vector<1x1x8x8xf32>
      %11 = vector.shape_cast %10 : vector<1x1x8x8xf32> to vector<8x8xf32>
      %cst = arith.constant 0.353553385 : f32
      %12 = vector.broadcast %cst : f32 to vector<8x8xf32>
      %13 = arith.mulf %11, %12 : vector<8x8xf32>
      %c0_7 = arith.constant 0 : index
      %c0_8 = arith.constant 0 : index
      %c0_9 = arith.constant 0 : index
      %c0_10 = arith.constant 0 : index
      %14 = vector.load %arg5[%c0_7, %c0_8, %c0_9, %c0_10] : memref<1x1x16x8xf32, #tpu.memory_space<vmem>>, vector<1x1x16x8xf32>
      %15 = vector.shape_cast %14 : vector<1x1x16x8xf32> to vector<16x8xf32>
      %cst_11 = arith.constant dense<0.000000e+00> : vector<8x16xf32>
      %16 = tpu.matmul %13, %15, %cst_11 {dimension_numbers = #tpu.dot_dimension_numbers<[1], [1], [0], [0], [0, 0, 1, 0], [], []>} : vector<8x8xf32>, vector<16x8xf32>, vector<8x16xf32> -> vector<8x16xf32>
      %c16_i32_12 = arith.constant 16 : i32
      %17 = arith.addi %3, %c16_i32_12 : i32
      %c1_i32 = arith.constant 1 : i32
      %18 = arith.subi %17, %c1_i32 : i32
      %c4_i32 = arith.constant 4 : i32
      %19 = arith.cmpi sgt, %18, %c4_i32 : i32
      %20 = arith.extui %19 : i1 to i32
      %c0_i32_13 = arith.constant 0 : i32
      %21 = arith.cmpi ne, %20, %c0_i32_13 : i32
      %22 = scf.if %21 -> (vector<8x16xf32>) {
        %47 = tpu.iota {dimensions = array<i32: 0>} : vector<8x16xi32>
        %48 = tpu.iota {dimensions = array<i32: 1>} : vector<8x16xi32>
        %c8_i32 = arith.constant 8 : i32
        %c0_i32_33 = arith.constant 0 : i32
        %49 = arith.cmpi eq, %c8_i32, %c0_i32_33 : i32
        %c1_i32_34 = arith.constant 1 : i32
        %50 = arith.select %49, %c1_i32_34, %c8_i32 : i32
        %51 = vector.broadcast %50 : i32 to vector<8x16xi32>
        %52 = arith.remsi %47, %51 : vector<8x16xi32>
        %c0_i32_35 = arith.constant 0 : i32
        %53 = vector.broadcast %c0_i32_35 : i32 to vector<8x16xi32>
        %54 = arith.cmpi ne, %52, %53 : vector<8x16xi32>
        %c0_i32_36 = arith.constant 0 : i32
        %55 = vector.broadcast %c0_i32_36 : i32 to vector<8x16xi32>
        %56 = arith.cmpi slt, %52, %55 : vector<8x16xi32>
        %c0_i32_37 = arith.constant 0 : i32
        %57 = arith.cmpi slt, %50, %c0_i32_37 : i32
        %58 = vector.broadcast %57 : i1 to vector<8x16xi1>
        %59 = vector.broadcast %58 : vector<8x16xi1> to vector<8x16xi1>
        %60 = arith.xori %56, %59 : vector<8x16xi1>
        %61 = arith.andi %60, %54 : vector<8x16xi1>
        %62 = vector.broadcast %50 : i32 to vector<8x16xi32>
        %63 = arith.addi %52, %62 : vector<8x16xi32>
        %64 = arith.select %61, %63, %52 : vector<8x16xi1>, vector<8x16xi32>
        %c4_i32_38 = arith.constant 4 : i32
        %65 = vector.broadcast %c4_i32_38 : i32 to vector<8x16xi32>
        %66 = arith.addi %65, %64 : vector<8x16xi32>
        %67 = vector.broadcast %3 : i32 to vector<8x16xi32>
        %68 = arith.addi %67, %48 : vector<8x16xi32>
        %69 = arith.cmpi sle, %68, %66 : vector<8x16xi32>
        %cst_39 = arith.constant -1.000000e+30 : f32
        %70 = vector.broadcast %cst_39 : f32 to vector<8x16xf32>
        %71 = arith.select %69, %16, %70 : vector<8x16xi1>, vector<8x16xf32>
        scf.yield %71 : vector<8x16xf32>
      } else {
        scf.yield %16 : vector<8x16xf32>
      }
      %c0_14 = arith.constant 0 : index
      %c0_15 = arith.constant 0 : index
      %23 = vector.load %arg8[%c0_14, %c0_15] : memref<8x1xf32, #tpu.memory_space<vmem>>, vector<8x1xf32>
      %cst_16 = arith.constant dense<0xFF800000> : vector<8xf32>
      %24 = vector.multi_reduction <maximumf>, %22, %cst_16 [1] : vector<8x16xf32> to vector<8xf32>
      %25 = vector.shape_cast %24 : vector<8xf32> to vector<8x1xf32>
      %26 = arith.maximumf %23, %25 : vector<8x1xf32>
      %27 = arith.subf %23, %26 : vector<8x1xf32>
      %28 = math.exp %27 : vector<8x1xf32>
      %29 = vector.broadcast %26 : vector<8x1xf32> to vector<8x16xf32>
      %30 = arith.subf %22, %29 : vector<8x16xf32>
      %31 = math.exp %30 : vector<8x16xf32>
      %c0_17 = arith.constant 0 : index
      %c0_18 = arith.constant 0 : index
      %32 = vector.load %arg9[%c0_17, %c0_18] : memref<8x1xf32, #tpu.memory_space<vmem>>, vector<8x1xf32>
      %33 = arith.mulf %28, %32 : vector<8x1xf32>
      %cst_19 = arith.constant dense<0.000000e+00> : vector<8xf32>
      %34 = vector.multi_reduction <add>, %31, %cst_19 [1] : vector<8x16xf32> to vector<8xf32>
      %35 = vector.shape_cast %34 : vector<8xf32> to vector<8x1xf32>
      %36 = arith.addf %33, %35 : vector<8x1xf32>
      %c0_20 = arith.constant 0 : index
      %c0_21 = arith.constant 0 : index
      %37 = vector.load %arg9[%c0_20, %c0_21] : memref<8x1xf32, #tpu.memory_space<vmem>>, vector<8x1xf32>
      tpu.vector_store %arg9[%c0_20, %c0_21], %36 {strides = array<i32>} : memref<8x1xf32, #tpu.memory_space<vmem>>, vector<8x1xf32>,
      %c0_22 = arith.constant 0 : index
      %c0_23 = arith.constant 0 : index
      %38 = vector.load %arg10[%c0_22, %c0_23] : memref<8x8xf32, #tpu.memory_space<vmem>>, vector<8x8xf32>
      %39 = vector.broadcast %28 : vector<8x1xf32> to vector<8x8xf32>
      %40 = arith.mulf %39, %38 : vector<8x8xf32>
      %c0_24 = arith.constant 0 : index
      %c0_25 = arith.constant 0 : index
      %c0_26 = arith.constant 0 : index
      %c0_27 = arith.constant 0 : index
      %41 = vector.load %arg6[%c0_24, %c0_25, %c0_26, %c0_27] : memref<1x1x16x8xf32, #tpu.memory_space<vmem>>, vector<1x1x16x8xf32>
      %42 = vector.shape_cast %41 : vector<1x1x16x8xf32> to vector<16x8xf32>
      %cst_28 = arith.constant dense<0.000000e+00> : vector<8x8xf32>
      %43 = tpu.matmul %31, %42, %cst_28 {dimension_numbers = #tpu.dot_dimension_numbers<[1], [0], [0], [1], [0, 0, 1, 1], [], []>} : vector<8x16xf32>, vector<16x8xf32>, vector<8x8xf32> -> vector<8x8xf32>
      %44 = arith.addf %40, %43 : vector<8x8xf32>
      %c0_29 = arith.constant 0 : index
      %c0_30 = arith.constant 0 : index
      %45 = vector.load %arg10[%c0_29, %c0_30] : memref<8x8xf32, #tpu.memory_space<vmem>>, vector<8x8xf32>
      tpu.vector_store %arg10[%c0_29, %c0_30], %44 {strides = array<i32>} : memref<8x8xf32, #tpu.memory_space<vmem>>, vector<8x8xf32>,
      %c0_31 = arith.constant 0 : index
      %c0_32 = arith.constant 0 : index
      %46 = vector.load %arg8[%c0_31, %c0_32] : memref<8x1xf32, #tpu.memory_space<vmem>>, vector<8x1xf32>
      tpu.vector_store %arg8[%c0_31, %c0_32], %26 {strides = array<i32>} : memref<8x1xf32, #tpu.memory_space<vmem>>, vector<8x1xf32>,
    } else {
    }
    %c0_i32_2 = arith.constant 0 : i32
    %7 = arith.cmpi eq, %arg3, %c0_i32_2 : i32
    %8 = arith.extui %7 : i1 to i32
    %c0_i32_3 = arith.constant 0 : i32
    %9 = arith.cmpi ne, %8, %c0_i32_3 : i32
    scf.if %9 {
      %c0 = arith.constant 0 : index
      %c0_4 = arith.constant 0 : index
      %10 = vector.load %arg10[%c0, %c0_4] : memref<8x8xf32, #tpu.memory_space<vmem>>, vector<8x8xf32>
      %c0_5 = arith.constant 0 : index
      %c0_6 = arith.constant 0 : index
      %11 = vector.load %arg9[%c0_5, %c0_6] : memref<8x1xf32, #tpu.memory_space<vmem>>, vector<8x1xf32>
      %12 = tpu.reciprocal %11 {approx = true} : vector<8x1xf32> -> vector<8x1xf32>
      %13 = vector.broadcast %12 : vector<8x1xf32> to vector<8x8xf32>
      %14 = arith.mulf %10, %13 : vector<8x8xf32>
      %c0_7 = arith.constant 0 : index
      %c0_8 = arith.constant 0 : index
      %c0_9 = arith.constant 0 : index
      %c0_10 = arith.constant 0 : index
      %15 = vector.load %arg7[%c0_7, %c0_8, %c0_9, %c0_10] : memref<1x1x8x8xf32, #tpu.memory_space<vmem>>, vector<1x1x8x8xf32>
      %16 = vector.shape_cast %15 : vector<1x1x8x8xf32> to vector<8x8xf32>
      %17 = vector.shape_cast %14 : vector<8x8xf32> to vector<1x1x8x8xf32>
      tpu.vector_store %arg7[%c0_7, %c0_8, %c0_9, %c0_10], %17 {strides = array<i32>} : memref<1x1x8x8xf32, #tpu.memory_space<vmem>>, vector<1x1x8x8xf32>,
    } else {
    }
    return
  }
  func.func @transform_0(%arg0: i32, %arg1: i32, %arg2: i32, %arg3: i32) -> (i32, i32, i32, i32) {
    %c0_i32 = arith.constant 0 : i32
    %c0_i32_0 = arith.constant 0 : i32
    return %arg0, %arg1, %arg2, %c0_i32 : i32, i32, i32, i32
  }
  func.func @transform_1(%arg0: i32, %arg1: i32, %arg2: i32, %arg3: i32) -> (i32, i32, i32, i32) {
    %c0_i32 = arith.constant 0 : i32
    %c0_i32_0 = arith.constant 0 : i32
    return %arg0, %arg1, %arg3, %c0_i32 : i32, i32, i32, i32
  }
  func.func @transform_2(%arg0: i32, %arg1: i32, %arg2: i32, %arg3: i32) -> (i32, i32, i32, i32) {
    %c0_i32 = arith.constant 0 : i32
    %c0_i32_0 = arith.constant 0 : i32
    return %arg0, %arg1, %arg3, %c0_i32 : i32, i32, i32, i32
  }
  func.func @transform_3(%arg0: i32, %arg1: i32, %arg2: i32, %arg3: i32) -> (i32, i32, i32, i32) {
    %c0_i32 = arith.constant 0 : i32
    %c0_i32_0 = arith.constant 0 : i32
    return %arg0, %arg1, %arg2, %c0_i32 : i32, i32, i32, i32
  }
}

module attributes {stable_mosaic.version = 11 : i64} {
  func.func @_matmul_residual_kernel(%arg0: i32, %arg1: i32, %arg2: i32, %arg3: memref<16x32xf32, #tpu.memory_space<vmem>>, %arg4: memref<32x32xf32, #tpu.memory_space<vmem>>, %arg5: memref<16x32xf32, #tpu.memory_space<vmem>>, %arg6: memref<16x32xf32, #tpu.memory_space<vmem>>, %arg7: memref<16x32xf32, #tpu.memory_space<vmem>>) attributes {dimension_semantics = [#tpu.dimension_semantics<parallel>, #tpu.dimension_semantics<parallel>, #tpu.dimension_semantics<arbitrary>], iteration_bounds = array<i64: 1, 1, 1>, scalar_prefetch = 0 : i64, scratch_operands = 1 : i64, tpu.core_type = #tpu.core_type<tc>, window_params = [{transform_indices = @transform_0, window_bounds = array<i64: 16, 32>}, {transform_indices = @transform_1, window_bounds = array<i64: 32, 32>}, {transform_indices = @transform_2, window_bounds = array<i64: 16, 32>}, {transform_indices = @transform_3, window_bounds = array<i64: 16, 32>}]} {
    %c0_i32 = arith.constant 0 : i32
    %0 = arith.cmpi eq, %arg2, %c0_i32 : i32
    %1 = arith.extui %0 : i1 to i32
    %c0_i32_0 = arith.constant 0 : i32
    %2 = arith.cmpi ne, %1, %c0_i32_0 : i32
    scf.if %2 {
      %cst_10 = arith.constant 0.000000e+00 : f32
      %12 = vector.broadcast %cst_10 : f32 to vector<16x32xf32>
      %c0_11 = arith.constant 0 : index
      %c0_12 = arith.constant 0 : index
      %13 = vector.load %arg7[%c0_11, %c0_12] : memref<16x32xf32, #tpu.memory_space<vmem>>, vector<16x32xf32>
      tpu.vector_store %arg7[%c0_11, %c0_12], %12 {strides = array<i32>} : memref<16x32xf32, #tpu.memory_space<vmem>>, vector<16x32xf32>,
    } else {
    }
    %c0 = arith.constant 0 : index
    %c0_1 = arith.constant 0 : index
    %3 = vector.load %arg7[%c0, %c0_1] : memref<16x32xf32, #tpu.memory_space<vmem>>, vector<16x32xf32>
    %c0_2 = arith.constant 0 : index
    %c0_3 = arith.constant 0 : index
    %4 = vector.load %arg3[%c0_2, %c0_3] : memref<16x32xf32, #tpu.memory_space<vmem>>, vector<16x32xf32>
    %c0_4 = arith.constant 0 : index
    %c0_5 = arith.constant 0 : index
    %5 = vector.load %arg4[%c0_4, %c0_5] : memref<32x32xf32, #tpu.memory_space<vmem>>, vector<32x32xf32>
    %cst = arith.constant dense<0.000000e+00> : vector<16x32xf32>
    %6 = tpu.matmul %4, %5, %cst {dimension_numbers = #tpu.dot_dimension_numbers<[1], [0], [0], [1], [0, 0, 1, 1], [], []>} : vector<16x32xf32>, vector<32x32xf32>, vector<16x32xf32> -> vector<16x32xf32>
    %7 = arith.addf %3, %6 : vector<16x32xf32>
    %c0_6 = arith.constant 0 : index
    %c0_7 = arith.constant 0 : index
    %8 = vector.load %arg7[%c0_6, %c0_7] : memref<16x32xf32, #tpu.memory_space<vmem>>, vector<16x32xf32>
    tpu.vector_store %arg7[%c0_6, %c0_7], %7 {strides = array<i32>} : memref<16x32xf32, #tpu.memory_space<vmem>>, vector<16x32xf32>,
    %c0_i32_8 = arith.constant 0 : i32
    %9 = arith.cmpi eq, %arg2, %c0_i32_8 : i32
    %10 = arith.extui %9 : i1 to i32
    %c0_i32_9 = arith.constant 0 : i32
    %11 = arith.cmpi ne, %10, %c0_i32_9 : i32
    scf.if %11 {
      %c0_10 = arith.constant 0 : index
      %c0_11 = arith.constant 0 : index
      %12 = vector.load %arg7[%c0_10, %c0_11] : memref<16x32xf32, #tpu.memory_space<vmem>>, vector<16x32xf32>
      %c0_12 = arith.constant 0 : index
      %c0_13 = arith.constant 0 : index
      %13 = vector.load %arg5[%c0_12, %c0_13] : memref<16x32xf32, #tpu.memory_space<vmem>>, vector<16x32xf32>
      %14 = arith.addf %12, %13 : vector<16x32xf32>
      %c0_14 = arith.constant 0 : index
      %c0_15 = arith.constant 0 : index
      %15 = vector.load %arg6[%c0_14, %c0_15] : memref<16x32xf32, #tpu.memory_space<vmem>>, vector<16x32xf32>
      tpu.vector_store %arg6[%c0_14, %c0_15], %14 {strides = array<i32>} : memref<16x32xf32, #tpu.memory_space<vmem>>, vector<16x32xf32>,
    } else {
    }
    return
  }
  func.func @transform_0(%arg0: i32, %arg1: i32, %arg2: i32) -> (i32, i32) {
    %c0_i32 = arith.constant 0 : i32
    return %arg0, %arg2 : i32, i32
  }
  func.func @transform_1(%arg0: i32, %arg1: i32, %arg2: i32) -> (i32, i32) {
    %c0_i32 = arith.constant 0 : i32
    return %arg2, %arg1 : i32, i32
  }
  func.func @transform_2(%arg0: i32, %arg1: i32, %arg2: i32) -> (i32, i32) {
    %c0_i32 = arith.constant 0 : i32
    return %arg0, %arg1 : i32, i32
  }
  func.func @transform_3(%arg0: i32, %arg1: i32, %arg2: i32) -> (i32, i32) {
    %c0_i32 = arith.constant 0 : i32
    return %arg0, %arg1 : i32, i32
  }
}

module attributes {stable_mosaic.version = 11 : i64} {
  func.func @_rmsnorm_swiglu_kernel(%arg0: i32, %arg1: i32, %arg2: i32, %arg3: memref<16x32xf32, #tpu.memory_space<vmem>>, %arg4: memref<1x32xf32, #tpu.memory_space<vmem>>, %arg5: memref<32x64xf32, #tpu.memory_space<vmem>>, %arg6: memref<32x64xf32, #tpu.memory_space<vmem>>, %arg7: memref<16x64xf32, #tpu.memory_space<vmem>>, %arg8: memref<1x16x32xf32, #tpu.memory_space<vmem>>, %arg9: memref<16x64xf32, #tpu.memory_space<vmem>>, %arg10: memref<16x64xf32, #tpu.memory_space<vmem>>) attributes {dimension_semantics = [#tpu.dimension_semantics<parallel>, #tpu.dimension_semantics<arbitrary>, #tpu.dimension_semantics<arbitrary>], iteration_bounds = array<i64: 1, 1, 1>, scalar_prefetch = 0 : i64, scratch_operands = 3 : i64, tpu.core_type = #tpu.core_type<tc>, window_params = [{transform_indices = @transform_0, window_bounds = array<i64: 16, 32>}, {pipeline_mode = #tpu.pipeline_mode<synchronous>, transform_indices = @transform_1, window_bounds = array<i64: 1, 32>}, {transform_indices = @transform_2, window_bounds = array<i64: 32, 64>}, {transform_indices = @transform_3, window_bounds = array<i64: 32, 64>}, {transform_indices = @transform_4, window_bounds = array<i64: 16, 64>}]} {
    %c0_i32 = arith.constant 0 : i32
    %0 = arith.cmpi eq, %arg1, %c0_i32 : i32
    %c0_i32_0 = arith.constant 0 : i32
    %1 = arith.cmpi eq, %arg2, %c0_i32_0 : i32
    %2 = arith.andi %0, %1 : i1
    %3 = arith.extui %2 : i1 to i32
    %c0_i32_1 = arith.constant 0 : i32
    %4 = arith.cmpi ne, %3, %c0_i32_1 : i32
    scf.if %4 {
      %c0_20 = arith.constant 0 : index
      %c0_21 = arith.constant 0 : index
      %24 = vector.load %arg3[%c0_20, %c0_21] : memref<16x32xf32, #tpu.memory_space<vmem>>, vector<16x32xf32>
      %25 = arith.mulf %24, %24 : vector<16x32xf32>
      %cst_22 = arith.constant dense<0.000000e+00> : vector<16xf32>
      %26 = vector.multi_reduction <add>, %25, %cst_22 [1] : vector<16x32xf32> to vector<16xf32>
      %27 = vector.shape_cast %26 : vector<16xf32> to vector<16x1xf32>
      %cst_23 = arith.constant 3.200000e+01 : f32
      %28 = vector.broadcast %cst_23 : f32 to vector<16x1xf32>
      %29 = arith.divf %27, %28 : vector<16x1xf32>
      %cst_24 = arith.constant 9.99999997E-7 : f32
      %30 = vector.broadcast %cst_24 : f32 to vector<16x1xf32>
      %31 = arith.addf %29, %30 : vector<16x1xf32>
      %32 = math.rsqrt %31 : vector<16x1xf32>
      %33 = vector.broadcast %32 : vector<16x1xf32> to vector<16x32xf32>
      %34 = arith.mulf %24, %33 : vector<16x32xf32>
      %c0_25 = arith.constant 0 : index
      %c0_26 = arith.constant 0 : index
      %35 = vector.load %arg4[%c0_25, %c0_26] : memref<1x32xf32, #tpu.memory_space<vmem>>, vector<1x32xf32>
      %36 = vector.broadcast %35 : vector<1x32xf32> to vector<16x32xf32>
      %37 = arith.mulf %34, %36 : vector<16x32xf32>
      %c0_27 = arith.constant 0 : index
      %c0_28 = arith.constant 0 : index
      %c0_29 = arith.constant 0 : index
      %38 = vector.load %arg8[%c0_27, %c0_28, %c0_29] : memref<1x16x32xf32, #tpu.memory_space<vmem>>, vector<1x16x32xf32>
      %39 = vector.shape_cast %38 : vector<1x16x32xf32> to vector<16x32xf32>
      %40 = vector.shape_cast %37 : vector<16x32xf32> to vector<1x16x32xf32>
      tpu.vector_store %arg8[%c0_27, %c0_28, %c0_29], %40 {strides = array<i32>} : memref<1x16x32xf32, #tpu.memory_space<vmem>>, vector<1x16x32xf32>,
    } else {
    }
    %c0_i32_2 = arith.constant 0 : i32
    %5 = arith.cmpi eq, %arg2, %c0_i32_2 : i32
    %6 = arith.extui %5 : i1 to i32
    %c0_i32_3 = arith.constant 0 : i32
    %7 = arith.cmpi ne, %6, %c0_i32_3 : i32
    scf.if %7 {
      %cst_20 = arith.constant 0.000000e+00 : f32
      %24 = vector.broadcast %cst_20 : f32 to vector<16x64xf32>
      %c0_21 = arith.constant 0 : index
      %c0_22 = arith.constant 0 : index
      %25 = vector.load %arg9[%c0_21, %c0_22] : memref<16x64xf32, #tpu.memory_space<vmem>>, vector<16x64xf32>
      tpu.vector_store %arg9[%c0_21, %c0_22], %24 {strides = array<i32>} : memref<16x64xf32, #tpu.memory_space<vmem>>, vector<16x64xf32>,
      %cst_23 = arith.constant 0.000000e+00 : f32
      %26 = vector.broadcast %cst_23 : f32 to vector<16x64xf32>
      %c0_24 = arith.constant 0 : index
      %c0_25 = arith.constant 0 : index
      %27 = vector.load %arg10[%c0_24, %c0_25] : memref<16x64xf32, #tpu.memory_space<vmem>>, vector<16x64xf32>
      tpu.vector_store %arg10[%c0_24, %c0_25], %26 {strides = array<i32>} : memref<16x64xf32, #tpu.memory_space<vmem>>, vector<16x64xf32>,
    } else {
    }
    %8 = arith.index_cast %arg2 : i32 to index
    %c0 = arith.constant 0 : index
    %c0_4 = arith.constant 0 : index
    %9 = vector.load %arg8[%8, %c0, %c0_4] : memref<1x16x32xf32, #tpu.memory_space<vmem>>, vector<1x16x32xf32>
    %10 = vector.shape_cast %9 : vector<1x16x32xf32> to vector<16x32xf32>
    %c0_5 = arith.constant 0 : index
    %c0_6 = arith.constant 0 : index
    %11 = vector.load %arg9[%c0_5, %c0_6] : memref<16x64xf32, #tpu.memory_space<vmem>>, vector<16x64xf32>
    %c0_7 = arith.constant 0 : index
    %c0_8 = arith.constant 0 : index
    %12 = vector.load %arg5[%c0_7, %c0_8] : memref<32x64xf32, #tpu.memory_space<vmem>>, vector<32x64xf32>
    %cst = arith.constant dense<0.000000e+00> : vector<16x64xf32>
    %13 = tpu.matmul %10, %12, %cst {dimension_numbers = #tpu.dot_dimension_numbers<[1], [0], [0], [1], [0, 0, 1, 1], [], []>} : vector<16x32xf32>, vector<32x64xf32>, vector<16x64xf32> -> vector<16x64xf32>
    %14 = arith.addf %11, %13 : vector<16x64xf32>
    %c0_9 = arith.constant 0 : index
    %c0_10 = arith.constant 0 : index
    %15 = vector.load %arg9[%c0_9, %c0_10] : memref<16x64xf32, #tpu.memory_space<vmem>>, vector<16x64xf32>
    tpu.vector_store %arg9[%c0_9, %c0_10], %14 {strides = array<i32>} : memref<16x64xf32, #tpu.memory_space<vmem>>, vector<16x64xf32>,
    %c0_11 = arith.constant 0 : index
    %c0_12 = arith.constant 0 : index
    %16 = vector.load %arg10[%c0_11, %c0_12] : memref<16x64xf32, #tpu.memory_space<vmem>>, vector<16x64xf32>
    %c0_13 = arith.constant 0 : index
    %c0_14 = arith.constant 0 : index
    %17 = vector.load %arg6[%c0_13, %c0_14] : memref<32x64xf32, #tpu.memory_space<vmem>>, vector<32x64xf32>
    %cst_15 = arith.constant dense<0.000000e+00> : vector<16x64xf32>
    %18 = tpu.matmul %10, %17, %cst_15 {dimension_numbers = #tpu.dot_dimension_numbers<[1], [0], [0], [1], [0, 0, 1, 1], [], []>} : vector<16x32xf32>, vector<32x64xf32>, vector<16x64xf32> -> vector<16x64xf32>
    %19 = arith.addf %16, %18 : vector<16x64xf32>
    %c0_16 = arith.constant 0 : index
    %c0_17 = arith.constant 0 : index
    %20 = vector.load %arg10[%c0_16, %c0_17] : memref<16x64xf32, #tpu.memory_space<vmem>>, vector<16x64xf32>
    tpu.vector_store %arg10[%c0_16, %c0_17], %19 {strides = array<i32>} : memref<16x64xf32, #tpu.memory_space<vmem>>, vector<16x64xf32>,
    %c0_i32_18 = arith.constant 0 : i32
    %21 = arith.cmpi eq, %arg2, %c0_i32_18 : i32
    %22 = arith.extui %21 : i1 to i32
    %c0_i32_19 = arith.constant 0 : i32
    %23 = arith.cmpi ne, %22, %c0_i32_19 : i32
    scf.if %23 {
      %c0_20 = arith.constant 0 : index
      %c0_21 = arith.constant 0 : index
      %24 = vector.load %arg9[%c0_20, %c0_21] : memref<16x64xf32, #tpu.memory_space<vmem>>, vector<16x64xf32>
      %25 = arith.negf %24 : vector<16x64xf32>
      %26 = math.exp %25 : vector<16x64xf32>
      %cst_22 = arith.constant 1.000000e+00 : f32
      %27 = vector.broadcast %cst_22 : f32 to vector<16x64xf32>
      %28 = arith.addf %27, %26 : vector<16x64xf32>
      %29 = arith.divf %27, %28 : vector<16x64xf32>
      %30 = arith.mulf %24, %29 : vector<16x64xf32>
      %c0_23 = arith.constant 0 : index
      %c0_24 = arith.constant 0 : index
      %31 = vector.load %arg10[%c0_23, %c0_24] : memref<16x64xf32, #tpu.memory_space<vmem>>, vector<16x64xf32>
      %32 = arith.mulf %30, %31 : vector<16x64xf32>
      %c0_25 = arith.constant 0 : index
      %c0_26 = arith.constant 0 : index
      %33 = vector.load %arg7[%c0_25, %c0_26] : memref<16x64xf32, #tpu.memory_space<vmem>>, vector<16x64xf32>
      tpu.vector_store %arg7[%c0_25, %c0_26], %32 {strides = array<i32>} : memref<16x64xf32, #tpu.memory_space<vmem>>, vector<16x64xf32>,
    } else {
    }
    return
  }
  func.func @transform_0(%arg0: i32, %arg1: i32, %arg2: i32) -> (i32, i32) {
    %c0_i32 = arith.constant 0 : i32
    %c0_i32_0 = arith.constant 0 : i32
    return %arg0, %c0_i32 : i32, i32
  }
  func.func @transform_1(%arg0: i32, %arg1: i32, %arg2: i32) -> (i32, i32) {
    %c0_i32 = arith.constant 0 : i32
    %c0_i32_0 = arith.constant 0 : i32
    %c0_i32_1 = arith.constant 0 : i32
    return %c0_i32, %c0_i32_0 : i32, i32
  }
  func.func @transform_2(%arg0: i32, %arg1: i32, %arg2: i32) -> (i32, i32) {
    %c0_i32 = arith.constant 0 : i32
    return %arg2, %arg1 : i32, i32
  }
  func.func @transform_3(%arg0: i32, %arg1: i32, %arg2: i32) -> (i32, i32) {
    %c0_i32 = arith.constant 0 : i32
    return %arg2, %arg1 : i32, i32
  }
  func.func @transform_4(%arg0: i32, %arg1: i32, %arg2: i32) -> (i32, i32) {
    %c0_i32 = arith.constant 0 : i32
    return %arg0, %arg1 : i32, i32
  }
}

module attributes {stable_mosaic.version = 11 : i64} {
  func.func @_matmul_residual_kernel(%arg0: i32, %arg1: i32, %arg2: i32, %arg3: memref<16x64xf32, #tpu.memory_space<vmem>>, %arg4: memref<64x32xf32, #tpu.memory_space<vmem>>, %arg5: memref<16x32xf32, #tpu.memory_space<vmem>>, %arg6: memref<16x32xf32, #tpu.memory_space<vmem>>, %arg7: memref<16x32xf32, #tpu.memory_space<vmem>>) attributes {dimension_semantics = [#tpu.dimension_semantics<parallel>, #tpu.dimension_semantics<parallel>, #tpu.dimension_semantics<arbitrary>], iteration_bounds = array<i64: 1, 1, 1>, scalar_prefetch = 0 : i64, scratch_operands = 1 : i64, tpu.core_type = #tpu.core_type<tc>, window_params = [{transform_indices = @transform_0, window_bounds = array<i64: 16, 64>}, {transform_indices = @transform_1, window_bounds = array<i64: 64, 32>}, {transform_indices = @transform_2, window_bounds = array<i64: 16, 32>}, {transform_indices = @transform_3, window_bounds = array<i64: 16, 32>}]} {
    %c0_i32 = arith.constant 0 : i32
    %0 = arith.cmpi eq, %arg2, %c0_i32 : i32
    %1 = arith.extui %0 : i1 to i32
    %c0_i32_0 = arith.constant 0 : i32
    %2 = arith.cmpi ne, %1, %c0_i32_0 : i32
    scf.if %2 {
      %cst_10 = arith.constant 0.000000e+00 : f32
      %12 = vector.broadcast %cst_10 : f32 to vector<16x32xf32>
      %c0_11 = arith.constant 0 : index
      %c0_12 = arith.constant 0 : index
      %13 = vector.load %arg7[%c0_11, %c0_12] : memref<16x32xf32, #tpu.memory_space<vmem>>, vector<16x32xf32>
      tpu.vector_store %arg7[%c0_11, %c0_12], %12 {strides = array<i32>} : memref<16x32xf32, #tpu.memory_space<vmem>>, vector<16x32xf32>,
    } else {
    }
    %c0 = arith.constant 0 : index
    %c0_1 = arith.constant 0 : index
    %3 = vector.load %arg7[%c0, %c0_1] : memref<16x32xf32, #tpu.memory_space<vmem>>, vector<16x32xf32>
    %c0_2 = arith.constant 0 : index
    %c0_3 = arith.constant 0 : index
    %4 = vector.load %arg3[%c0_2, %c0_3] : memref<16x64xf32, #tpu.memory_space<vmem>>, vector<16x64xf32>
    %c0_4 = arith.constant 0 : index
    %c0_5 = arith.constant 0 : index
    %5 = vector.load %arg4[%c0_4, %c0_5] : memref<64x32xf32, #tpu.memory_space<vmem>>, vector<64x32xf32>
    %cst = arith.constant dense<0.000000e+00> : vector<16x32xf32>
    %6 = tpu.matmul %4, %5, %cst {dimension_numbers = #tpu.dot_dimension_numbers<[1], [0], [0], [1], [0, 0, 1, 1], [], []>} : vector<16x64xf32>, vector<64x32xf32>, vector<16x32xf32> -> vector<16x32xf32>
    %7 = arith.addf %3, %6 : vector<16x32xf32>
    %c0_6 = arith.constant 0 : index
    %c0_7 = arith.constant 0 : index
    %8 = vector.load %arg7[%c0_6, %c0_7] : memref<16x32xf32, #tpu.memory_space<vmem>>, vector<16x32xf32>
    tpu.vector_store %arg7[%c0_6, %c0_7], %7 {strides = array<i32>} : memref<16x32xf32, #tpu.memory_space<vmem>>, vector<16x32xf32>,
    %c0_i32_8 = arith.constant 0 : i32
    %9 = arith.cmpi eq, %arg2, %c0_i32_8 : i32
    %10 = arith.extui %9 : i1 to i32
    %c0_i32_9 = arith.constant 0 : i32
    %11 = arith.cmpi ne, %10, %c0_i32_9 : i32
    scf.if %11 {
      %c0_10 = arith.constant 0 : index
      %c0_11 = arith.constant 0 : index
      %12 = vector.load %arg7[%c0_10, %c0_11] : memref<16x32xf32, #tpu.memory_space<vmem>>, vector<16x32xf32>
      %c0_12 = arith.constant 0 : index
      %c0_13 = arith.constant 0 : index
      %13 = vector.load %arg5[%c0_12, %c0_13] : memref<16x32xf32, #tpu.memory_space<vmem>>, vector<16x32xf32>
      %14 = arith.addf %12, %13 : vector<16x32xf32>
      %c0_14 = arith.constant 0 : index
      %c0_15 = arith.constant 0 : index
      %15 = vector.load %arg6[%c0_14, %c0_15] : memref<16x32xf32, #tpu.memory_space<vmem>>, vector<16x32xf32>
      tpu.vector_store %arg6[%c0_14, %c0_15], %14 {strides = array<i32>} : memref<16x32xf32, #tpu.memory_space<vmem>>, vector<16x32xf32>,
    } else {
    }
    return
  }
  func.func @transform_0(%arg0: i32, %arg1: i32, %arg2: i32) -> (i32, i32) {
    %c0_i32 = arith.constant 0 : i32
    return %arg0, %arg2 : i32, i32
  }
  func.func @transform_1(%arg0: i32, %arg1: i32, %arg2: i32) -> (i32, i32) {
    %c0_i32 = arith.constant 0 : i32
    return %arg2, %arg1 : i32, i32
  }
  func.func @transform_2(%arg0: i32, %arg1: i32, %arg2: i32) -> (i32, i32) {
    %c0_i32 = arith.constant 0 : i32
    return %arg0, %arg1 : i32, i32
  }
  func.func @transform_3(%arg0: i32, %arg1: i32, %arg2: i32) -> (i32, i32) {
    %c0_i32 = arith.constant 0 : i32
    return %arg0, %arg1 : i32, i32
  }
}

</mosaic_0001>

<bundles_post_ra>
// kernel: transformer_block.5
= control target key start
LH: loop header
LB: loop body
LE: loop exit
PB: predicated region body
PF: predicated region fallthrough
CT: control target
= control target key end

     0   :  { %vm24_vm0 = vcmask 261120   ;;  %vm54_vm1 = vcmask 523264   ;;  %v198_v12 = vmov 0.0   ;;  %s258_s0 = inlined_call_operand.vmem [shape: f32[16,32], index: 0, kind: input, shape index: {}]   ;;  %s259_s2 = inlined_call_operand.vmem [shape: f32[32,64], index: 2, kind: input, shape index: {}]   ;;  %s260_s1 = inlined_call_operand.vmem [shape: f32[1,32], index: 1, kind: input, shape index: {}]   ;;  %s261_s3 = inlined_call_operand.vmem [shape: f32[16,64], index: 3, kind: output, shape index: {}]  }
   0x1   :  { %v20_v0 = vld [vmem:[%s258_s0] sm:$0xff]  ;;  %v21_v1 = vld [vmem:[%s258_s0 + $0x8] sm:$0xff]  ;;  %v65_v9 = vld [vmem:[%s259_s2 + $0x10] sm:$0xff]  ;;  %56 = vst.msk [vmem:[#allocation3 + $0x8] sm:$0xff] %vm54_vm1, %v198_v12 }
   0x2   :  { %v22_v2 = vmul.f32 %v20_v0, %v20_v0  ;;  %v23_v3 = vmul.f32 %v21_v1, %v21_v1  ;;  %v63_v6 = vld [vmem:[%s259_s2] sm:$0xff]  ;;  %v64_v7 = vld [vmem:[%s259_s2 + $0x8] sm:$0xff]  ;;  %v66_v10 = vld [vmem:[%s259_s2 + $0x18] sm:$0xff]  ;;  %55 = vst.msk [vmem:[#allocation3] sm:$0xff] %vm54_vm1, %v198_v12 }
   0x3   :  { %v185_v8 = vpack.c.bf16 %v64_v7, %v63_v6  ;;  %v189_v11 = vpack.c.bf16 %v66_v10, %v65_v9  ;;  %v165_v20 = vld [vmem:[%s260_s1] ss:$0 sm:$0xff] }
   0x4   :  { %v25_v4 = vsel %vm24_vm0, %v22_v2, 0.0  ;;  %v28_v5 = vsel %vm24_vm0, %v23_v3, 0.0 }
   0x5   :  { %26 = vadd.xlane.f32.xlu0 %v25_v4  ;;  %186 = vmatprep.subr.bf16.mxu0 %v185_v8 }
   0x6   :  { %188 = vmatpush3.bf16.msra.mxu0 %v185_v8 }
   0x7   :  { %190 = vmatprep.subr.bf16.mxu0 %v189_v11 }
   0x8   :  { %v58_v28 = vld [vmem:[#allocation3 + $0x8] sm:$0xff] }
   0x9   :  { %29 = vadd.xlane.f32.xlu0 %v28_v5  ;;  %v57_v29 = vld [vmem:[#allocation3] sm:$0xff] }
   0xa   :  { %192 = vmatpush3.bf16.msra.mxu0 %v189_v11 }
  0x92   :  { %v27_v13 = vpop.xlane.xlu0 %26 }
  0x93   :  { %v32_v14 = vmul.f32 0.03125, %v27_v13 }
  0x95   :  { %v34_v15 = vadd.f32 1e-06, %v32_v14 }
  0x96   :  { %v30_v16 = vpop.xlane.xlu0 %29 }
  0x97   :  { %194 = vrsqrt.f32 %v34_v15  ;;  %v33_v17 = vmul.f32 0.03125, %v30_v16 }
  0x99   :  { %v35_v18 = vadd.f32 1e-06, %v33_v17 }
  0x9b   :  { %196 = vrsqrt.f32 %v35_v18 }
  0xa1   :  { %v195_v19 = vpop.eup %194 }
  0xa2   :  { %v38_v21 = vmul.f32 %v195_v19, %v20_v0 }
  0xa4   :  { %v47_v22 = vmul.f32 %v165_v20, %v38_v21 }
  0xa5   :  { %v197_v23 = vpop.eup %196 }
  0xa6   :  { %49 = vst.msk [vmem:[#allocation2] sm:$0xff] %vm24_vm0, %v47_v22  ;;  %v39_v24 = vmul.f32 %v197_v23, %v21_v1 }
  0xa8   :  { %v48_v25 = vmul.f32 %v165_v20, %v39_v24 }
  0xaa   :  { %50 = vst.msk [vmem:[#allocation2 + $0x8] sm:$0xff] %vm24_vm0, %v48_v25 }
  0xad   :  { %v61_v26 = vld [vmem:[#allocation2] sm:$0xff] }
  0xae   :  { %182 = vmatprep.mubr.msk.f32.mxu0 %vm24_vm0, %v61_v26 }
  0xb1   :  { %v62_v27 = vld [vmem:[#allocation2 + $0x8] sm:$0xff] }
  0xb2   :  { %183 = vmatmul.mubr.msk.f32.vlgmr.msra.gmra.mrb[0].mxu0 %vm24_vm0, %v62_v27 }
 0x185   :  { %v184_v30 = vpop.f32.mrb[0].mxu0 }
 0x186   :  { %v150_v31 = vadd.f32 %v184_v30, %v58_v28  ;;  %v140_v32 = vpop.f32.mrb[1].mxu0 }
 0x187   :  { %v149_v33 = vadd.f32 %v140_v32, %v57_v29 }
 0x188   :  { %153 = vst.msk [vmem:[#allocation3 + $0x8] sm:$0xff] %vm54_vm1, %v150_v31 }
 0x189   :  { %152 = vst.msk [vmem:[#allocation3] sm:$0xff] %vm54_vm1, %v149_v33 }
 0x18f   :  { %v158_v34 = vld [vmem:[#allocation3 + $0x8] sm:$0xff] }
 0x190   :  { %160 = vst.msk [vmem:[%s261_s3 + $0x8] sm:$0xff] %vm54_vm1, %v158_v34  ;;  %v157_v35 = vld [vmem:[#allocation3] sm:$0xff] }
 0x191   :  { %159 = vst.msk [vmem:[%s261_s3] sm:$0xff] %vm54_vm1, %v157_v35 }

// kernel: transformer_block.6
= control target key start
LH: loop header
LB: loop body
LE: loop exit
PB: predicated region body
PF: predicated region fallthrough
CT: control target
= control target key end

     0   :  { %s958_s12 = smov 0   ;;  %s960_s13 = smov 0   ;;  %s1074_s0 = inlined_call_operand.vmem [shape: f32[2,2,16,8], index: 0, kind: input, shape index: {}]   ;;  %s1075_s1 = inlined_call_operand.vmem [shape: f32[2,2,16,8], index: 1, kind: input, shape index: {}]   ;;  %s1076_s2 = inlined_call_operand.vmem [shape: f32[2,2,16,8], index: 2, kind: input, shape index: {}]   ;;  %s1077_s3 = inlined_call_operand.vmem [shape: f32[2,2,16,8], index: 3, kind: output, shape index: {}]  }
   0x1   :  { %s962_s14 = smov 0   ;;  %s964_s15 = smov 0  }
   0x2   :  { %s966_s16 = smov 0   ;;  %s968_s17 = smov 0  }
   0x3   :  { %s970_s18 = smov 0  }
   0x4 LB: > { %s31_s19 = sadd.s32 1, %s919_s15  ;;  %s35_s20 = sadd.s32 1, %s923_s16  ;;  %s931_s18 = sphi %s970_s18, %s13_s18   ;;  %s927_s17 = sphi %s968_s17, %s1083_s17   ;;  %s923_s16 = sphi %s966_s16, %s1082_s16   ;;  %s919_s15 = sphi %s964_s15, %s1081_s15   ;;  %s915_s14 = sphi %s962_s14, %s1080_s14   ;;  %s911_s13 = sphi %s960_s13, %s1079_s13   ;;  %s907_s12 = sphi %s958_s12, %s1078_s12  }
   0x5   : > { %p33_p0 = scmp.ge.s32.totalorder %s31_s19, 2  ;;  %p762_p1 = scmp.ge.s32.totalorder %s931_s18, 1 }
   0x6   : > { %p224_p2 = scmp.lt.s32.totalorder %s931_s18, 9  ;;  %s39_s21 = sadd.s32 1, %s927_s17 }
   0x7   : > { %s1085_s19 = smov (%p33_p0, %s31_s19), 0  ;;  %s1087_s20 = smov (!%p33_p0, %s35_s20), %s923_s16 }
   0x8   : > { %p225_p3 = pnand %p762_p1, %p224_p2  ;;  %p37_p4 = scmp.ge.s32.totalorder %s1087_s20, 2 }
   0x9   : > { %p288_p6 = scmp.lt.s32.totalorder (!%p225_p3), %s915_s14, 1  ;;  %p290_p7 = scmp.lt.s32.totalorder (!%p225_p3), %s911_s13, 1  ;;  %vm347_vm0 = vcmask (!%p225_p3), 64512   ;;  %vm344_vm1 = vcmask (!%p225_p3), 7168   ;;  %v933_v0 = vmov (!%p225_p3), 0.0|0.0   ;;  %v934_v1 = vmov (!%p225_p3), 0.0  }
   0xa   : > { %s1089_s20 = smov (%p37_p4, %s1087_s20), 0  ;;  %s1091_s21 = smov (!%p37_p4, %s39_s21), %s927_s17 }
   0xb   : > { %p41_p5 = scmp.ge.s32.totalorder %s1091_s21, 2  ;;  %228 = sbr.rel (%p225_p3) target bundleno = 830 (0x33e), region = 32  ;;  %801 = vmatprep.subr.bf16.mxu0 (!%p225_p3), %v933_v0  ;;  %346 = vst.msk [vmem:[#allocation3] sm:$0xff] (!%p225_p3), %vm344_vm1, %v934_v1  ;;  %805 = vmatprep.subr.bf16.mxu1 (!%p225_p3), %v933_v0  ;;  %vm935_vm2 = vmmov (!%p225_p3), 0   ;;  %vm803_vm3 = vmpackc.low (!%p225_p3), %vm347_vm0, %vm347_vm0  ;;  %v936_v7 = vmov (!%p225_p3), -1e+30   ;;  %v443_v8 = vlaneseq (!%p225_p3) }
   0xc   : > { %p292_p8 = scmp.lt.s32.totalorder (!%p225_p3), %s907_s12, 1  ;;  %348 = vst.msk [vmem:[#allocation4] sm:$0xff] (!%p225_p3), %vm347_vm0, %v934_v1  ;;  %791 = vmatprep.mubr.msk.f32.mxu0 (!%p225_p3), %vm935_vm2, %v934_v1  ;;  %798 = vmatprep.mubr.msk.f32.mxu1 (!%p225_p3), %vm935_vm2, %v934_v1  ;;  %vm470_vm5 = vcmask (!%p225_p3), 130048   ;;  %v937_v17 = vmov (!%p225_p3), 0  }
   0xd   : > { %s1093_s21 = smov (%p41_p5, %s1091_s21), 0  ;;  %345 = vst.msk [vmem:[#allocation2] sm:$0xff] (!%p225_p3), %vm344_vm1, %v936_v7  ;;  %v444_v9 = vshrl.u32 (!%p225_p3), %v443_v8, 7  ;;  %v446_v11 = vand.u32 (!%p225_p3), 127, %v443_v8  ;;  %869 = vset.pattern.permute.xlu0 (!%p225_p3), %v937_v17  ;;  %870 = vset.pattern.permute.xlu1 (!%p225_p3), %v937_v17 }
   0xf   : > { %v451_v10 = vand.u32 (!%p225_p3), 7, %v444_v9 }
  0x11   : > { %v459_v12 = vadd.s32 (!%p225_p3), 4, %v451_v10 }
  0x12   : > { %s1095_s14 = smov (!%p288_p6, %s915_s14), 1  ;;  %s1097_s13 = smov (!%p290_p7, %s911_s13), 1  ;;  %v486_v32 = vld [vmem:[#allocation3] sm:$0xff] }
  0x13   : > { %s1099_s12 = smov (!%p292_p8, %s907_s12), 1  ;;  %s763_s22 = sshll.u32 %s1097_s13, 1  ;;  %vm462_vm4 = vcmp.le.s32.totalorder %v446_v11, %v459_v12  ;;  %v494_v38 = vld [vmem:[#allocation4] sm:$0xff] }
  0x14   : > { %s764_s23 = sshll.u32 %s1095_s14, 2  ;;  %s295_s24 = sadd.s32 %s763_s22, %s1099_s12  ;;  %v469_v18 = vld [vmem:[#allocation2] sm:$0xff] }
  0x15   : > { %s1016_s25 = sadd.s32 %s764_s23, %s763_s22  ;;  %s1019_s27 = sadd.s32 %s764_s23, %s295_s24 }
  0x16   : > { %s768_s26 = sshll.u32 %s1016_s25, 3  ;;  %s765_s4 = sshll.u32 %s1019_s27, 3 }
  0x17   : > { %s312_s30 = scalar_lea.vmem %s1075_s1, %s768_s26  ;;  %s299_s7 = scalar_lea.vmem %s1074_s0, %s765_s4 }
  0x18   : > { %v356_v2 = vld [vmem:[%s312_s30] sm:$0xff]  ;;  %v357_v3 = vld [vmem:[%s312_s30 + $0x8] sm:$0xff]  ;;  %s326_s10 = scalar_lea.vmem %s1076_s2, %s768_s26  ;;  %s339_s13 = scalar_lea.vmem %s1077_s3, %s765_s4 }
  0x19   : > { %v802_v4 = vpack.c.bf16 %v357_v3, %v356_v2  ;;  %v354_v5 = vld [vmem:[%s299_s7] sm:$0xff]  ;;  %v502_v23 = vld [vmem:[%s326_s10 + $0x8] sm:$0xff] }
  0x1a   : > { %v355_v6 = vmul.f32 0.35355338, %v354_v5  ;;  %v501_v22 = vld [vmem:[%s326_s10] sm:$0xff] }
  0x1b   : > { %804 = vmatpush3.bf16.xpose.msk.msra.mxu0 %vm803_vm3, %v802_v4  ;;  %v806_v24 = vpack.c.bf16 %v502_v23, %v501_v22 }
  0x1d   : > { %807 = vmatpush3.bf16.msra.mxu1 %v806_v24 }
  0x22   : > { %792 = vmatmul.mubr.msk.f32.vlgmr.msra.gmra.mrb[0].mxu0 %vm347_vm0, %v355_v6 }
  0xf5   : > { %v434_v13 = vpop.f32.mrb[0].mxu0 }
  0xf6   : > { %v463_v14 = vsel %vm462_vm4, %v434_v13, -1e+30  ;;  %v793_v15 = vpop.f32.mrb[1].mxu0 }
  0xf7   : > { %v471_v16 = vsel %vm470_vm5, %v463_v14, -inf }
  0xf8   : > { %472 = vmax.xlane.f32.xlu0 %v471_v16 }
 0x185   : > { %v473_v19 = vpop.xlane.xlu0 %472 }
 0x186   : > { %v474_v20 = vmax.f32 %v469_v18, %v473_v19 }
 0x188   : > { %v475_v21 = vsub.f32 %v469_v18, %v474_v20  ;;  %578 = vst.msk [vmem:[#allocation2] sm:$0xff] %vm344_vm1, %v474_v20  ;;  %480 = vperm.xlu0 %869, %v474_v20  }
 0x18a   : > { %v476_v30 = vmul.f32 1.442695, %v475_v21 }
 0x207   : > { %v481_v25 = vpop.permute.xlu0 %480 }
 0x208   : > { %v483_v26 = vsub.f32 %v463_v14, %v481_v25 }
 0x20a   : > { %v484_v27 = vmul.f32 1.442695, %v483_v26 }
 0x20c   : > { %871 = vpow2.f32 %v484_v27 }
 0x20d   : > { %873 = vpow2.f32 %v476_v30 }
 0x216   : > { %v872_v28 = vpop.eup %871 }
 0x217   : > { %799 = vmatmul.mubr.msk.f32.vlgmr.msra.gmra.mrb[0].mxu1 %vm470_vm5, %v872_v28  ;;  %v488_v29 = vsel %vm470_vm5, %v872_v28, 0.0  ;;  %v874_v31 = vpop.eup %873 }
 0x218   : > { %489 = vadd.xlane.f32.xlu1 %v488_v29  ;;  %v487_v33 = vmul.f32 %v874_v31, %v486_v32 }
 0x229   : > { %497 = vperm.xlu1 %870, %v874_v31  }
 0x2a5   : > { %v490_v34 = vpop.xlane.xlu1 %489 }
 0x2a6   : > { %v491_v35 = vadd.f32 %v490_v34, %v487_v33 }
 0x2a8   : > { %493 = vst.msk [vmem:[#allocation3] sm:$0xff] %vm344_vm1, %v491_v35 }
 0x2a9   : > { %v498_v39 = vpop.permute.xlu1 %497 }
 0x2aa   : > { %v500_v40 = vmul.f32 %v498_v39, %v494_v38 }
 0x2af   : > { %v583_v36 = vld [vmem:[#allocation3] sm:$0xff] }
 0x2b0   : > { %875 = vrcp.f32 %v583_v36 }
 0x2ba   : > { %v876_v37 = vpop.eup %875 }
 0x2bb   : > { %587 = vperm.xlu1 %870, %v876_v37  }
 0x2ea   : > { %v572_v41 = vpop.f32.mrb[0].mxu1 }
 0x2eb   : > { %v576_v42 = vadd.f32 %v572_v41, %v500_v40  ;;  %v800_v43 = vpop.f32.mrb[1].mxu1 }
 0x2ed   : > { %577 = vst.msk [vmem:[#allocation4] sm:$0xff] %vm347_vm0, %v576_v42 }
 0x2f4   : > { %v582_v44 = vld [vmem:[#allocation4] sm:$0xff] }
 0x33a   : > { %v588_v45 = vpop.permute.xlu1 %587 }
 0x33b   : > { %v590_v46 = vmul.f32 %v588_v45, %v582_v44 }
 0x33d   : > { %592 = vst.msk [vmem:[%s339_s13] sm:$0xff] %vm347_vm0, %v590_v46 }
 0x33e PF: > { %s13_s18 = sadd.s32 1, %s931_s18   ;;  %s1078_s12 = smov %s919_s15 }
 0x33f   : > { %p10_p9 = scmp.ge.s32.totalorder %s13_s18, 10   ;;  %s1079_s13 = smov %s923_s16 }
 0x340   : > { %s1080_s14 = smov %s927_s17  ;;  %s1081_s15 = smov %s1085_s19 }
 0x341   : > { %s1082_s16 = smov %s1089_s20  ;;  %s1083_s17 = smov %s1093_s21 }
 0x342   :  { %12 = sbr.rel (!%p10_p9) target bundleno = 4 (0x4), region = 88 }

// kernel: transformer_block.7
= control target key start
LH: loop header
LB: loop body
LE: loop exit
PB: predicated region body
PF: predicated region fallthrough
CT: control target
= control target key end

     0   :  { %vm18_vm0 = vcmask 261120   ;;  %v158_v3 = vmov 0.0   ;;  %s217_s1 = inlined_call_operand.vmem [shape: f32[32,32], index: 1, kind: input, shape index: {}]   ;;  %s218_s0 = inlined_call_operand.vmem [shape: f32[16,32], index: 0, kind: input, shape index: {}]   ;;  %s219_s2 = inlined_call_operand.vmem [shape: f32[16,32], index: 2, kind: input, shape index: {}, may-alias: {2,3}]   ;;  %s220_s3 = inlined_call_operand.vmem [shape: f32[16,32], index: 3, kind: output, shape index: {}, may-alias: {2,3}]  }
   0x1   :  { %v25_v0 = vld [vmem:[%s217_s1] sm:$0xff]  ;;  %v26_v1 = vld [vmem:[%s217_s1 + $0x8] sm:$0xff]  ;;  %v27_v2 = vld [vmem:[%s217_s1 + $0x10] sm:$0xff]  ;;  %20 = vst.msk [vmem:[#allocation2 + $0x8] sm:$0xff] %vm18_vm0, %v158_v3 }
   0x2   :  { %19 = vst.msk [vmem:[#allocation2] sm:$0xff] %vm18_vm0, %v158_v3  ;;  %v149_v4 = vpack.c.bf16 %v26_v1, %v25_v0  ;;  %v28_v5 = vld [vmem:[%s217_s1 + $0x18] sm:$0xff]  ;;  %v23_v6 = vld [vmem:[%s218_s0] sm:$0xff]  ;;  %v24_v8 = vld [vmem:[%s218_s0 + $0x8] sm:$0xff] }
   0x3   :  { %v153_v7 = vpack.c.bf16 %v28_v5, %v27_v2  ;;  %146 = vmatprep.mubr.msk.f32.mxu0 %vm18_vm0, %v23_v6  ;;  %v121_v15 = vld [vmem:[%s219_s2 + $0x8] sm:$0xff]  ;;  %v120_v16 = vld [vmem:[%s219_s2] sm:$0xff] }
   0x4   :  { %150 = vmatprep.subr.bf16.mxu0 %v149_v4 }
   0x5   :  { %152 = vmatpush3.bf16.msra.mxu0 %v149_v4 }
   0x6   :  { %154 = vmatprep.subr.bf16.mxu0 %v153_v7 }
   0x8   :  { %v22_v9 = vld [vmem:[#allocation2 + $0x8] sm:$0xff] }
   0x9   :  { %156 = vmatpush3.bf16.msra.mxu0 %v153_v7  ;;  %v21_v10 = vld [vmem:[#allocation2] sm:$0xff] }
   0xc   :  { %147 = vmatmul.mubr.msk.f32.vlgmr.msra.gmra.mrb[0].mxu0 %vm18_vm0, %v24_v8 }
  0xdf   :  { %v148_v11 = vpop.f32.mrb[0].mxu0 }
  0xe0   :  { %v112_v12 = vadd.f32 %v148_v11, %v22_v9  ;;  %v102_v13 = vpop.f32.mrb[1].mxu0 }
  0xe1   :  { %v111_v14 = vadd.f32 %v102_v13, %v21_v10 }
  0xe2   :  { %114 = vst.msk [vmem:[#allocation2 + $0x8] sm:$0xff] %vm18_vm0, %v112_v12 }
  0xe3   :  { %113 = vst.msk [vmem:[#allocation2] sm:$0xff] %vm18_vm0, %v111_v14 }
  0xe9   :  { %v119_v17 = vld [vmem:[#allocation2 + $0x8] sm:$0xff] }
  0xea   :  { %v123_v18 = vadd.f32 %v121_v15, %v119_v17  ;;  %v118_v19 = vld [vmem:[#allocation2] sm:$0xff] }
  0xeb   :  { %v122_v20 = vadd.f32 %v120_v16, %v118_v19 }
  0xec   :  { %125 = vst.msk [vmem:[%s220_s3 + $0x8] sm:$0xff] %vm18_vm0, %v123_v18 }
  0xed   :  { %124 = vst.msk [vmem:[%s220_s3] sm:$0xff] %vm18_vm0, %v122_v20 }

// kernel: transformer_block.9
= control target key start
LH: loop header
LB: loop body
LE: loop exit
PB: predicated region body
PF: predicated region fallthrough
CT: control target
= control target key end

     0   :  { %vm18_vm0 = vcmask 261120   ;;  %vm33_vm1 = vcmask 523264   ;;  %v183_v3 = vmov 0.0   ;;  %s254_s1 = inlined_call_operand.vmem [shape: f32[64,32], index: 1, kind: input, shape index: {}]   ;;  %s255_s0 = inlined_call_operand.vmem [shape: f32[16,64], index: 0, kind: input, shape index: {}]   ;;  %s256_s2 = inlined_call_operand.vmem [shape: f32[16,32], index: 2, kind: input, shape index: {}, may-alias: {2,3}]   ;;  %s257_s3 = inlined_call_operand.vmem [shape: f32[16,32], index: 3, kind: output, shape index: {}, may-alias: {2,3}]  }
   0x1   :  { %v25_v0 = vld [vmem:[%s254_s1] sm:$0xff]  ;;  %v26_v1 = vld [vmem:[%s254_s1 + $0x8] sm:$0xff]  ;;  %v27_v2 = vld [vmem:[%s254_s1 + $0x10] sm:$0xff]  ;;  %20 = vst.msk [vmem:[#allocation2 + $0x8] sm:$0xff] %vm18_vm0, %v183_v3 }
   0x2   :  { %19 = vst.msk [vmem:[#allocation2] sm:$0xff] %vm18_vm0, %v183_v3  ;;  %v166_v4 = vpack.c.bf16 %v26_v1, %v25_v0  ;;  %v28_v5 = vld [vmem:[%s254_s1 + $0x18] sm:$0xff]  ;;  %v29_v7 = vld [vmem:[%s254_s1 + $0x20] sm:$0xff]  ;;  %v30_v8 = vld [vmem:[%s254_s1 + $0x28] sm:$0xff] }
   0x3   :  { %v170_v6 = vpack.c.bf16 %v28_v5, %v27_v2  ;;  %v23_v9 = vld [vmem:[%s255_s0] sm:$0xff]  ;;  %v174_v10 = vpack.c.bf16 %v30_v8, %v29_v7  ;;  %v31_v11 = vld [vmem:[%s254_s1 + $0x30] sm:$0xff]  ;;  %v32_v12 = vld [vmem:[%s254_s1 + $0x38] sm:$0xff] }
   0x4   :  { %167 = vmatprep.subr.bf16.mxu0 %v166_v4  ;;  %163 = vmatprep.mubr.msk.f32.mxu0 %vm33_vm1, %v23_v9  ;;  %v178_v13 = vpack.c.bf16 %v32_v12, %v31_v11  ;;  %v24_v14 = vld [vmem:[%s255_s0 + $0x8] sm:$0xff]  ;;  %v125_v22 = vld [vmem:[%s256_s2] sm:$0xff] }
   0x5   :  { %169 = vmatpush3.bf16.msra.mxu0 %v166_v4  ;;  %v126_v21 = vld [vmem:[%s256_s2 + $0x8] sm:$0xff] }
   0x6   :  { %171 = vmatprep.subr.bf16.mxu0 %v170_v6 }
   0x8   :  { %v22_v15 = vld [vmem:[#allocation2 + $0x8] sm:$0xff] }
   0x9   :  { %173 = vmatpush3.bf16.msra.mxu0 %v170_v6  ;;  %v21_v16 = vld [vmem:[#allocation2] sm:$0xff] }
   0xa   :  { %175 = vmatprep.subr.bf16.mxu0 %v174_v10 }
   0xd   :  { %177 = vmatpush3.bf16.msra.mxu0 %v174_v10 }
   0xe   :  { %179 = vmatprep.subr.bf16.mxu0 %v178_v13 }
  0x11   :  { %181 = vmatpush3.bf16.msra.mxu0 %v178_v13 }
  0x14   :  { %164 = vmatmul.mubr.msk.f32.vlgmr.msra.gmra.mrb[0].mxu0 %vm33_vm1, %v24_v14 }
  0xe7   :  { %v165_v17 = vpop.f32.mrb[0].mxu0 }
  0xe8   :  { %v116_v18 = vadd.f32 %v165_v17, %v22_v15  ;;  %v106_v19 = vpop.f32.mrb[1].mxu0 }
  0xe9   :  { %v115_v20 = vadd.f32 %v106_v19, %v21_v16 }
  0xea   :  { %119 = vst.msk [vmem:[#allocation2 + $0x8] sm:$0xff] %vm18_vm0, %v116_v18 }
  0xeb   :  { %118 = vst.msk [vmem:[#allocation2] sm:$0xff] %vm18_vm0, %v115_v20 }
  0xf1   :  { %v124_v23 = vld [vmem:[#allocation2 + $0x8] sm:$0xff] }
  0xf2   :  { %v128_v24 = vadd.f32 %v126_v21, %v124_v23  ;;  %v123_v25 = vld [vmem:[#allocation2] sm:$0xff] }
  0xf3   :  { %v127_v26 = vadd.f32 %v125_v22, %v123_v25 }
  0xf4   :  { %130 = vst.msk [vmem:[%s257_s3 + $0x8] sm:$0xff] %vm18_vm0, %v128_v24 }
  0xf5   :  { %129 = vst.msk [vmem:[%s257_s3] sm:$0xff] %vm18_vm0, %v127_v26 }

// kernel: transformer_block.8
= control target key start
LH: loop header
LB: loop body
LE: loop exit
PB: predicated region body
PF: predicated region fallthrough
CT: control target
= control target key end

     0   :  { %vm27_vm0 = vcmask 261120   ;;  %vm57_vm1 = vcmask 523264   ;;  %v343_v18 = vmov 0.0   ;;  %s426_s0 = inlined_call_operand.vmem [shape: f32[16,32], index: 0, kind: input, shape index: {}]   ;;  %s427_s2 = inlined_call_operand.vmem [shape: f32[32,64], index: 2, kind: input, shape index: {}]   ;;  %s428_s3 = inlined_call_operand.vmem [shape: f32[32,64], index: 3, kind: input, shape index: {}]   ;;  %s429_s1 = inlined_call_operand.vmem [shape: f32[1,32], index: 1, kind: input, shape index: {}]   ;;  %s430_s4 = inlined_call_operand.vmem [shape: f32[16,64], index: 4, kind: output, shape index: {}]  }
   0x1   :  { %v23_v0 = vld [vmem:[%s426_s0] sm:$0xff]  ;;  %v24_v1 = vld [vmem:[%s426_s0 + $0x8] sm:$0xff]  ;;  %v70_v12 = vld [vmem:[%s427_s2 + $0x10] sm:$0xff]  ;;  %59 = vst.msk [vmem:[#allocation3 + $0x8] sm:$0xff] %vm57_vm1, %v343_v18 }
   0x2   :  { %v25_v2 = vmul.f32 %v23_v0, %v23_v0  ;;  %v26_v3 = vmul.f32 %v24_v1, %v24_v1  ;;  %v68_v6 = vld [vmem:[%s427_s2] sm:$0xff]  ;;  %v69_v7 = vld [vmem:[%s427_s2 + $0x8] sm:$0xff]  ;;  %v71_v13 = vld [vmem:[%s427_s2 + $0x18] sm:$0xff]  ;;  %58 = vst.msk [vmem:[#allocation3] sm:$0xff] %vm57_vm1, %v343_v18 }
   0x3   :  { %v161_v8 = vld [vmem:[%s428_s3] sm:$0xff]  ;;  %v314_v9 = vpack.c.bf16 %v69_v7, %v68_v6  ;;  %v162_v10 = vld [vmem:[%s428_s3 + $0x8] sm:$0xff]  ;;  %v318_v14 = vpack.c.bf16 %v71_v13, %v70_v12  ;;  %v163_v15 = vld [vmem:[%s428_s3 + $0x10] sm:$0xff]  ;;  %60 = vst.msk [vmem:[#allocation4] sm:$0xff] %vm57_vm1, %v343_v18 }
   0x4   :  { %v28_v4 = vsel %vm27_vm0, %v25_v2, 0.0  ;;  %v31_v5 = vsel %vm27_vm0, %v26_v3, 0.0  ;;  %v322_v11 = vpack.c.bf16 %v162_v10, %v161_v8  ;;  %v164_v16 = vld [vmem:[%s428_s3 + $0x18] sm:$0xff]  ;;  %61 = vst.msk [vmem:[#allocation4 + $0x8] sm:$0xff] %vm57_vm1, %v343_v18  ;;  %v273_v26 = vld [vmem:[%s429_s1] ss:$0 sm:$0xff] }
   0x5   :  { %29 = vadd.xlane.f32.xlu0 %v28_v4  ;;  %315 = vmatprep.subr.bf16.mxu0 %v314_v9  ;;  %v326_v17 = vpack.c.bf16 %v164_v16, %v163_v15 }
   0x6   :  { %323 = vmatprep.subr.bf16.mxu1 %v322_v11  ;;  %317 = vmatpush3.bf16.msra.mxu0 %v314_v9 }
   0x7   :  { %325 = vmatpush3.bf16.msra.mxu1 %v322_v11  ;;  %319 = vmatprep.subr.bf16.mxu0 %v318_v14 }
   0x8   :  { %327 = vmatprep.subr.bf16.mxu1 %v326_v17  ;;  %v67_v34 = vld [vmem:[#allocation3 + $0x8] sm:$0xff] }
   0x9   :  { %32 = vadd.xlane.f32.xlu0 %v31_v5  ;;  %v66_v36 = vld [vmem:[#allocation3] sm:$0xff] }
   0xa   :  { %321 = vmatpush3.bf16.msra.mxu0 %v318_v14  ;;  %v159_v37 = vld [vmem:[#allocation4] sm:$0xff] }
   0xb   :  { %329 = vmatpush3.bf16.msra.mxu1 %v326_v17  ;;  %v160_v35 = vld [vmem:[#allocation4 + $0x8] sm:$0xff] }
  0x92   :  { %v30_v19 = vpop.xlane.xlu0 %29 }
  0x93   :  { %v35_v20 = vmul.f32 0.03125, %v30_v19 }
  0x95   :  { %v37_v21 = vadd.f32 1e-06, %v35_v20 }
  0x96   :  { %v33_v22 = vpop.xlane.xlu0 %32 }
  0x97   :  { %331 = vrsqrt.f32 %v37_v21  ;;  %v36_v23 = vmul.f32 0.03125, %v33_v22 }
  0x99   :  { %v38_v24 = vadd.f32 1e-06, %v36_v23 }
  0x9b   :  { %333 = vrsqrt.f32 %v38_v24 }
  0xa1   :  { %v332_v25 = vpop.eup %331 }
  0xa2   :  { %v41_v27 = vmul.f32 %v332_v25, %v23_v0 }
  0xa4   :  { %v50_v28 = vmul.f32 %v273_v26, %v41_v27 }
  0xa5   :  { %v334_v29 = vpop.eup %333 }
  0xa6   :  { %52 = vst.msk [vmem:[#allocation2] sm:$0xff] %vm27_vm0, %v50_v28  ;;  %v42_v30 = vmul.f32 %v334_v29, %v24_v1 }
  0xa8   :  { %v51_v31 = vmul.f32 %v273_v26, %v42_v30 }
  0xaa   :  { %53 = vst.msk [vmem:[#allocation2 + $0x8] sm:$0xff] %vm27_vm0, %v51_v31 }
  0xad   :  { %v64_v32 = vld [vmem:[#allocation2] sm:$0xff] }
  0xae   :  { %300 = vmatprep.mubr.msk.f32.mxu0 %vm27_vm0, %v64_v32  ;;  %311 = vmatprep.mubr.msk.f32.mxu1 %vm27_vm0, %v64_v32 }
  0xb1   :  { %v65_v33 = vld [vmem:[#allocation2 + $0x8] sm:$0xff] }
  0xb2   :  { %301 = vmatmul.mubr.msk.f32.vlgmr.msra.gmra.mrb[0].mxu0 %vm27_vm0, %v65_v33  ;;  %312 = vmatmul.mubr.msk.f32.vlgmr.msra.gmra.mrb[0].mxu1 %vm27_vm0, %v65_v33 }
 0x185   :  { %v302_v38 = vpop.f32.mrb[0].mxu0  ;;  %v313_v39 = vpop.f32.mrb[0].mxu1 }
 0x186   :  { %v155_v40 = vadd.f32 %v302_v38, %v67_v34  ;;  %v241_v41 = vadd.f32 %v313_v39, %v160_v35  ;;  %v145_v42 = vpop.f32.mrb[1].mxu0  ;;  %v231_v43 = vpop.f32.mrb[1].mxu1 }
 0x187   :  { %v154_v44 = vadd.f32 %v145_v42, %v66_v36  ;;  %v240_v45 = vadd.f32 %v231_v43, %v159_v37 }
 0x188   :  { %158 = vst.msk [vmem:[#allocation3 + $0x8] sm:$0xff] %vm57_vm1, %v155_v40  ;;  %243 = vst.msk [vmem:[#allocation4 + $0x8] sm:$0xff] %vm57_vm1, %v241_v41 }
 0x189   :  { %157 = vst.msk [vmem:[#allocation3] sm:$0xff] %vm57_vm1, %v154_v44  ;;  %242 = vst.msk [vmem:[#allocation4] sm:$0xff] %vm57_vm1, %v240_v45 }
 0x18f   :  { %v248_v46 = vld [vmem:[#allocation3 + $0x8] sm:$0xff]  ;;  %v264_v57 = vld [vmem:[#allocation4 + $0x8] sm:$0xff] }
 0x190   :  { %v279_v47 = vmul.f32 -1.442695, %v248_v46  ;;  %v247_v48 = vld [vmem:[#allocation3] sm:$0xff]  ;;  %v263_v60 = vld [vmem:[#allocation4] sm:$0xff] }
 0x191   :  { %v278_v49 = vmul.f32 -1.442695, %v247_v48 }
 0x192   :  { %335 = vpow2.f32 %v279_v47 }
 0x193   :  { %337 = vpow2.f32 %v278_v49 }
 0x19c   :  { %v336_v50 = vpop.eup %335 }
 0x19d   :  { %v338_v51 = vpop.eup %337  ;;  %v256_v52 = vadd.f32 1.0, %v336_v50 }
 0x19e   :  { %v255_v53 = vadd.f32 1.0, %v338_v51 }
 0x19f   :  { %339 = vrcp.f32 %v256_v52 }
 0x1a0   :  { %341 = vrcp.f32 %v255_v53 }
 0x1a9   :  { %v340_v54 = vpop.eup %339 }
 0x1aa   :  { %v342_v55 = vpop.eup %341  ;;  %v262_v56 = vmul.f32 %v340_v54, %v248_v46 }
 0x1ab   :  { %v261_v58 = vmul.f32 %v342_v55, %v247_v48 }
 0x1ac   :  { %v266_v59 = vmul.f32 %v264_v57, %v262_v56 }
 0x1ad   :  { %v265_v61 = vmul.f32 %v263_v60, %v261_v58 }
 0x1ae   :  { %268 = vst.msk [vmem:[%s430_s4 + $0x8] sm:$0xff] %vm57_vm1, %v266_v59 }
 0x1af   :  { %267 = vst.msk [vmem:[%s430_s4] sm:$0xff] %vm57_vm1, %v265_v61 }

</bundles_post_ra>
